<compile_context>
chip_gen: v5e
topology: v5e:2x2
jax: 0.10.0
libtpu: 0.0.40
codegen_flags: <defaults>
</compile_context>

<pallas_src>
import functools

import jax
import jax.numpy as jnp
from jax.experimental import pallas as pl
from jax.experimental.pallas import tpu as pltpu


def _gsc_kernel(x_ref, w3_ref, w1_ref, gam_ref, bet_ref, o_ref, *, C, H, W, eps):
    # x_ref:   (1, C, H*W)   f32   one sample, channels on sublanes, spatial on lanes
    # w3_ref:  (2, 9, C, C)  bf16  proj1/proj2 3x3 weights, one (Cout,Cin) matrix per tap
    # w1_ref:  (2, C, C)     bf16  proj3/proj4 1x1 weights
    # gam_ref: (4, C, 1)     f32   InstanceNorm gamma for proj1..proj4
    # bet_ref: (4, C, 1)     f32   InstanceNorm beta  for proj1..proj4
    # o_ref:   (1, C, H*W)   f32
    HW = H * W
    inv_hw = 1.0 / HW

    x = x_ref[0]                                  # (C, HW) f32, kept for outer residual
    xb = x.astype(jnp.bfloat16)                   # cast ONCE; reused by proj1 and proj3

    # Hoisted column-wrap masks, built directly at (C, HW) so they are materialized
    # once and reused by both 3x3 convs (no per-tap re-broadcast).
    col = jax.lax.broadcasted_iota(jnp.int32, (C, HW), 1) % W
    keep_left = col >= 1              # tap reads one column to the left
    keep_right = col <= (W - 2)       # tap reads one column to the right
    zero_b = jnp.zeros((), dtype=jnp.bfloat16)

    def inorm_relu(y, gamma, beta):
        # Two-pass InstanceNorm (centered variance avoids catastrophic cancellation)
        # with the affine folded into a single multiply-add on the centered value.
        mean = jnp.sum(y, axis=1, keepdims=True) * inv_hw            # (C, 1)
        c = y - mean
        var = jnp.sum(c * c, axis=1, keepdims=True) * inv_hw         # (C, 1)
        scale = jax.lax.rsqrt(var + eps) * gamma                     # (C, 1)
        return jnp.maximum(c * scale + beta, 0.0)                    # ReLU

    def conv3x3(vb, p):
        # vb: (C, HW) bf16.  Nine accumulated (C,C)@(C,HW) matmuls, one per tap.
        # Taps are lane-shifted slices of one zero-padded bf16 buffer: vertical
        # halo handled by the pad, horizontal wrap masked.  No (9C,HW) im2col,
        # no sublane-axis concatenate.
        zpad = jnp.zeros((C, W + 1), dtype=jnp.bfloat16)
        flat = jnp.concatenate([zpad, vb, zpad], axis=1)             # (C, HW+2W+2) bf16
        acc = jnp.zeros((C, HW), dtype=jnp.float32)
        for kh in range(3):
            for kw in range(3):
                start = kh * W + kw          # == (kh-1)*W + (kw-1) + (W+1)
                tap = flat[:, start:start + HW]                      # (C, HW) bf16
                if kw == 0:
                    tap = jnp.where(keep_left, tap, zero_b)
                elif kw == 2:
                    tap = jnp.where(keep_right, tap, zero_b)
                acc = acc + jnp.dot(w3_ref[p, kh * 3 + kw], tap,
                                    preferred_element_type=jnp.float32)
        return acc

    # proj1 -> proj2 (3x3 BasicConvBlocks)
    a = inorm_relu(conv3x3(xb, 0), gam_ref[0], bet_ref[0])
    a = inorm_relu(conv3x3(a.astype(jnp.bfloat16), 1), gam_ref[1], bet_ref[1])
    # proj3 (1x1 BasicConvBlock) on the original input, gated add
    b = inorm_relu(jnp.dot(w1_ref[0], xb, preferred_element_type=jnp.float32),
                   gam_ref[2], bet_ref[2])
    g = a + b
    # proj4 (1x1 BasicConvBlock) + outer residual
    g = inorm_relu(jnp.dot(w1_ref[1], g.astype(jnp.bfloat16),
                           preferred_element_type=jnp.float32),
                   gam_ref[3], bet_ref[3])
    o_ref[0] = (g + x).astype(o_ref.dtype)


def gsc_forward(x, w_proj1, w_proj2, w_proj3, w_proj4, gammas, betas, *, eps=1e-5):
    """GSC forward pass.

    x        : (N, C, H, W) f32, NCHW (PyTorch layout)
    w_proj1/2: (C, C, 3, 3) OIHW conv weights (bias=False)
    w_proj3/4: (C, C, 1, 1) OIHW conv weights
    gammas, betas : (4, C) InstanceNorm affine params for proj1..proj4
    returns  : (N, C, H, W) f32
    """
    N, C, H, W = x.shape
    HW = H * W

    # Pad channels to a sublane-friendly multiple of 8 (review).  Padded channels
    # have zero weights / gamma / beta, so they stay exactly zero through every
    # block and the outer residual; sliced off after the call.
    Cp = ((C + 7) // 8) * 8
    pad_c = Cp - C

    def prep3(w):   # OIHW (C,C,3,3) -> (9, Cp, Cp): one (Cout, Cin) matrix per tap
        w = jnp.transpose(w, (2, 3, 0, 1)).reshape(9, C, C)
        if pad_c:
            w = jnp.pad(w, ((0, 0), (0, pad_c), (0, pad_c)))
        return w.astype(jnp.bfloat16)

    def prep1(w):   # (C,C,1,1) -> (Cp, Cp)
        w = w.reshape(C, C)
        if pad_c:
            w = jnp.pad(w, ((0, pad_c), (0, pad_c)))
        return w.astype(jnp.bfloat16)

    w3 = jnp.stack([prep3(w_proj1), prep3(w_proj2)])           # (2, 9, Cp, Cp) bf16
    w1 = jnp.stack([prep1(w_proj3), prep1(w_proj4)])           # (2, Cp, Cp)    bf16
    gam = gammas.astype(jnp.float32)
    bet = betas.astype(jnp.float32)
    if pad_c:
        gam = jnp.pad(gam, ((0, 0), (0, pad_c)))
        bet = jnp.pad(bet, ((0, 0), (0, pad_c)))
    gam = gam.reshape(4, Cp, 1)
    bet = bet.reshape(4, Cp, 1)

    x_flat = x.reshape(N, C, HW).astype(jnp.float32)           # contiguous -> free reshape
    if pad_c:
        x_flat = jnp.pad(x_flat, ((0, 0), (0, pad_c), (0, 0)))

    kernel = functools.partial(_gsc_kernel, C=Cp, H=H, W=W, eps=eps)

    # VMEM budget from the actual footprint: in/out f32 blocks (double-buffered),
    # grid-invariant weights (double-buffered by default), and live in-kernel temps.
    # Clamp to [32 MiB, 64 MiB] — safe on v5e/v6e (128 MiB) and v7x (64 MiB).
    io_block = Cp * HW * 4
    weight_bytes = (2 * 9 * Cp * Cp + 2 * Cp * Cp) * 2 + 8 * Cp * 4
    temp_bytes = 8 * Cp * HW * 4          # x, padded tap buffer, acc, a, b, g, masks, slack
    est = 2 * 2 * io_block + 2 * weight_bytes + temp_bytes
    vmem_limit = int(min(max(3 * est // 2, 32 * 1024 * 1024), 64 * 1024 * 1024))

    out_flat = pl.pallas_call(
        kernel,
        out_shape=jax.ShapeDtypeStruct((N, Cp, HW), jnp.float32),
        grid_spec=pltpu.PrefetchScalarGridSpec(
            num_scalar_prefetch=0,
            grid=(N,),
            in_specs=[
                pl.BlockSpec((1, Cp, HW), lambda n: (n, 0, 0)),
                # Grid-invariant weight / affine blocks (constant index_map).
                pl.BlockSpec((2, 9, Cp, Cp), lambda n: (0, 0, 0, 0)),
                pl.BlockSpec((2, Cp, Cp), lambda n: (0, 0, 0)),
                pl.BlockSpec((4, Cp, 1), lambda n: (0, 0, 0)),
                pl.BlockSpec((4, Cp, 1), lambda n: (0, 0, 0)),
            ],
            out_specs=pl.BlockSpec((1, Cp, HW), lambda n: (n, 0, 0)),
        ),
        compiler_params=pltpu.CompilerParams(
            dimension_semantics=("parallel",),
            vmem_limit_bytes=vmem_limit,
        ),
    )(x_flat, w3, w1, gam, bet)

    return out_flat[:, :C, :].reshape(N, C, H, W)


# ----------------------------- pure-JAX reference -----------------------------

def _block_ref(x, w, gamma, beta, eps):
    # Mirrors the kernel: bf16 conv operands, f32 accumulation, f32 norm/ReLU.
    y = jax.lax.conv_general_dilated(
        x.astype(jnp.bfloat16), w.astype(jnp.bfloat16),
        window_strides=(1, 1), padding="SAME",
        dimension_numbers=("NCHW", "OIHW", "NCHW"),
        preferred_element_type=jnp.float32)
    mean = jnp.mean(y, axis=(2, 3), keepdims=True)
    var = jnp.mean((y - mean) ** 2, axis=(2, 3), keepdims=True)
    y = (y - mean) * jax.lax.rsqrt(var + eps)
    y = y * gamma.reshape(1, -1, 1, 1) + beta.reshape(1, -1, 1, 1)
    return jnp.maximum(y, 0.0)


def gsc_reference(x, w1, w2, w3, w4, gammas, betas, eps=1e-5):
    x1 = _block_ref(x, w1, gammas[0], betas[0], eps)
    x1 = _block_ref(x1, w2, gammas[1], betas[1], eps)
    x2 = _block_ref(x, w3, gammas[2], betas[2], eps)
    y = _block_ref(x1 + x2, w4, gammas[3], betas[3], eps)
    return y + x


if __name__ == "__main__":
    key = jax.random.PRNGKey(0)
    kx, k1, k2, k3, k4, kg, kb = jax.random.split(key, 7)

    N, C, H, W = 2, 4, 16, 16

    x = jax.random.normal(kx, (N, C, H, W), dtype=jnp.float32)
    w1 = 0.1 * jax.random.normal(k1, (C, C, 3, 3), dtype=jnp.float32)
    w2 = 0.1 * jax.random.normal(k2, (C, C, 3, 3), dtype=jnp.float32)
    w3 = 0.3 * jax.random.normal(k3, (C, C, 1, 1), dtype=jnp.float32)
    w4 = 0.3 * jax.random.normal(k4, (C, C, 1, 1), dtype=jnp.float32)
    gammas = 1.0 + 0.1 * jax.random.normal(kg, (4, C), dtype=jnp.float32)
    betas = 0.1 * jax.random.normal(kb, (4, C), dtype=jnp.float32)

    out = jax.block_until_ready(gsc_forward(x, w1, w2, w3, w4, gammas, betas))
    ref = jax.block_until_ready(gsc_reference(x, w1, w2, w3, w4, gammas, betas))

    assert out.shape == (N, C, H, W)
    err = float(jnp.max(jnp.abs(out - ref)))
    # Both paths use bf16 matmul operands; tolerance covers bf16 rounding drift
    # across the cascaded blocks.
    assert err < 2e-2, err
    print("KERNEL_OK")
</pallas_src>

<mosaic_0001>
module attributes {stable_mosaic.version = 11 : i64} {
  func.func @_gsc_kernel(%arg0: i32, %arg1: memref<1x8x256xf32, #tpu.memory_space<vmem>>, %arg2: memref<2x9x8x8xbf16, #tpu.memory_space<vmem>>, %arg3: memref<2x8x8xbf16, #tpu.memory_space<vmem>>, %arg4: memref<4x8x1xf32, #tpu.memory_space<vmem>>, %arg5: memref<4x8x1xf32, #tpu.memory_space<vmem>>, %arg6: memref<1x8x256xf32, #tpu.memory_space<vmem>>) attributes {dimension_semantics = [#tpu.dimension_semantics<parallel>], iteration_bounds = array<i64: 2>, scalar_prefetch = 0 : i64, scratch_operands = 0 : i64, tpu.core_type = #tpu.core_type<tc>, window_params = [{transform_indices = @transform_0, window_bounds = array<i64: 1, 8, 256>}, {pipeline_mode = #tpu.pipeline_mode<synchronous>, transform_indices = @transform_1, window_bounds = array<i64: 2, 9, 8, 8>}, {pipeline_mode = #tpu.pipeline_mode<synchronous>, transform_indices = @transform_2, window_bounds = array<i64: 2, 8, 8>}, {pipeline_mode = #tpu.pipeline_mode<synchronous>, transform_indices = @transform_3, window_bounds = array<i64: 4, 8, 1>}, {pipeline_mode = #tpu.pipeline_mode<synchronous>, transform_indices = @transform_4, window_bounds = array<i64: 4, 8, 1>}, {transform_indices = @transform_5, window_bounds = array<i64: 1, 8, 256>}]} {
    %c0 = arith.constant 0 : index
    %c0_0 = arith.constant 0 : index
    %c0_1 = arith.constant 0 : index
    %0 = vector.load %arg1[%c0, %c0_0, %c0_1] : memref<1x8x256xf32, #tpu.memory_space<vmem>>, vector<1x8x256xf32>
    %1 = vector.shape_cast %0 : vector<1x8x256xf32> to vector<8x256xf32>
    %2 = arith.truncf %1 : vector<8x256xf32> to vector<8x256xbf16>
    %3 = tpu.iota {dimensions = array<i32: 1>} : vector<8x256xi32>
    %c16_i32 = arith.constant 16 : i32
    %c0_i32 = arith.constant 0 : i32
    %4 = arith.cmpi eq, %c16_i32, %c0_i32 : i32
    %c1_i32 = arith.constant 1 : i32
    %5 = arith.select %4, %c1_i32, %c16_i32 : i32
    %6 = vector.broadcast %5 : i32 to vector<8x256xi32>
    %7 = arith.remsi %3, %6 : vector<8x256xi32>
    %c0_i32_2 = arith.constant 0 : i32
    %8 = vector.broadcast %c0_i32_2 : i32 to vector<8x256xi32>
    %9 = arith.cmpi ne, %7, %8 : vector<8x256xi32>
    %c0_i32_3 = arith.constant 0 : i32
    %10 = vector.broadcast %c0_i32_3 : i32 to vector<8x256xi32>
    %11 = arith.cmpi slt, %7, %10 : vector<8x256xi32>
    %c0_i32_4 = arith.constant 0 : i32
    %12 = arith.cmpi slt, %5, %c0_i32_4 : i32
    %13 = vector.broadcast %12 : i1 to vector<8x256xi1>
    %14 = vector.broadcast %13 : vector<8x256xi1> to vector<8x256xi1>
    %15 = arith.xori %11, %14 : vector<8x256xi1>
    %16 = arith.andi %15, %9 : vector<8x256xi1>
    %17 = vector.broadcast %5 : i32 to vector<8x256xi32>
    %18 = arith.addi %7, %17 : vector<8x256xi32>
    %19 = arith.select %16, %18, %7 : vector<8x256xi1>, vector<8x256xi32>
    %c1_i32_5 = arith.constant 1 : i32
    %20 = vector.broadcast %c1_i32_5 : i32 to vector<8x256xi32>
    %21 = arith.cmpi sge, %19, %20 : vector<8x256xi32>
    %c14_i32 = arith.constant 14 : i32
    %22 = vector.broadcast %c14_i32 : i32 to vector<8x256xi32>
    %23 = arith.cmpi sle, %19, %22 : vector<8x256xi32>
    %cst = arith.constant 0.000000e+00 : bf16
    %24 = vector.broadcast %cst : bf16 to vector<8x17xbf16>
    %25 = tpu.concatenate %24, %2, %24 in 1 : vector<8x17xbf16>, vector<8x256xbf16>, vector<8x17xbf16> -> vector<8x290xbf16>
    %cst_6 = arith.constant 0.000000e+00 : f32
    %26 = vector.broadcast %cst_6 : f32 to vector<8x256xf32>
    %27 = vector.extract_strided_slice %25 {offsets = [0, 0], sizes = [8, 256], strides = [1, 1]} : vector<8x290xbf16> to vector<8x256xbf16>
    %cst_7 = arith.constant 0.000000e+00 : bf16
    %28 = vector.broadcast %cst_7 : bf16 to vector<8x256xbf16>
    %29 = arith.select %21, %27, %28 : vector<8x256xi1>, vector<8x256xbf16>
    %c0_8 = arith.constant 0 : index
    %c0_9 = arith.constant 0 : index
    %c0_10 = arith.constant 0 : index
    %c0_11 = arith.constant 0 : index
    %30 = vector.load %arg2[%c0_8, %c0_9, %c0_10, %c0_11] : memref<2x9x8x8xbf16, #tpu.memory_space<vmem>>, vector<1x1x8x8xbf16>
    %31 = vector.shape_cast %30 : vector<1x1x8x8xbf16> to vector<8x8xbf16>
    %cst_12 = arith.constant dense<0.000000e+00> : vector<8x256xf32>
    %32 = tpu.matmul %31, %29, %cst_12 {dimension_numbers = #tpu.dot_dimension_numbers<[1], [0], [0], [1], [0, 0, 1, 1], [], []>} : vector<8x8xbf16>, vector<8x256xbf16>, vector<8x256xf32> -> vector<8x256xf32>
    %33 = arith.addf %26, %32 : vector<8x256xf32>
    %34 = vector.extract_strided_slice %25 {offsets = [0, 1], sizes = [8, 256], strides = [1, 1]} : vector<8x290xbf16> to vector<8x256xbf16>
    %c0_13 = arith.constant 0 : index
    %c1 = arith.constant 1 : index
    %c0_14 = arith.constant 0 : index
    %c0_15 = arith.constant 0 : index
    %35 = vector.load %arg2[%c0_13, %c1, %c0_14, %c0_15] : memref<2x9x8x8xbf16, #tpu.memory_space<vmem>>, vector<1x1x8x8xbf16>
    %36 = vector.shape_cast %35 : vector<1x1x8x8xbf16> to vector<8x8xbf16>
    %cst_16 = arith.constant dense<0.000000e+00> : vector<8x256xf32>
    %37 = tpu.matmul %36, %34, %cst_16 {dimension_numbers = #tpu.dot_dimension_numbers<[1], [0], [0], [1], [0, 0, 1, 1], [], []>} : vector<8x8xbf16>, vector<8x256xbf16>, vector<8x256xf32> -> vector<8x256xf32>
    %38 = arith.addf %33, %37 : vector<8x256xf32>
    %39 = vector.extract_strided_slice %25 {offsets = [0, 2], sizes = [8, 256], strides = [1, 1]} : vector<8x290xbf16> to vector<8x256xbf16>
    %cst_17 = arith.constant 0.000000e+00 : bf16
    %40 = vector.broadcast %cst_17 : bf16 to vector<8x256xbf16>
    %41 = arith.select %23, %39, %40 : vector<8x256xi1>, vector<8x256xbf16>
    %c0_18 = arith.constant 0 : index
    %c2 = arith.constant 2 : index
    %c0_19 = arith.constant 0 : index
    %c0_20 = arith.constant 0 : index
    %42 = vector.load %arg2[%c0_18, %c2, %c0_19, %c0_20] : memref<2x9x8x8xbf16, #tpu.memory_space<vmem>>, vector<1x1x8x8xbf16>
    %43 = vector.shape_cast %42 : vector<1x1x8x8xbf16> to vector<8x8xbf16>
    %cst_21 = arith.constant dense<0.000000e+00> : vector<8x256xf32>
    %44 = tpu.matmul %43, %41, %cst_21 {dimension_numbers = #tpu.dot_dimension_numbers<[1], [0], [0], [1], [0, 0, 1, 1], [], []>} : vector<8x8xbf16>, vector<8x256xbf16>, vector<8x256xf32> -> vector<8x256xf32>
    %45 = arith.addf %38, %44 : vector<8x256xf32>
    %46 = vector.extract_strided_slice %25 {offsets = [0, 16], sizes = [8, 256], strides = [1, 1]} : vector<8x290xbf16> to vector<8x256xbf16>
    %cst_22 = arith.constant 0.000000e+00 : bf16
    %47 = vector.broadcast %cst_22 : bf16 to vector<8x256xbf16>
    %48 = arith.select %21, %46, %47 : vector<8x256xi1>, vector<8x256xbf16>
    %c0_23 = arith.constant 0 : index
    %c3 = arith.constant 3 : index
    %c0_24 = arith.constant 0 : index
    %c0_25 = arith.constant 0 : index
    %49 = vector.load %arg2[%c0_23, %c3, %c0_24, %c0_25] : memref<2x9x8x8xbf16, #tpu.memory_space<vmem>>, vector<1x1x8x8xbf16>
    %50 = vector.shape_cast %49 : vector<1x1x8x8xbf16> to vector<8x8xbf16>
    %cst_26 = arith.constant dense<0.000000e+00> : vector<8x256xf32>
    %51 = tpu.matmul %50, %48, %cst_26 {dimension_numbers = #tpu.dot_dimension_numbers<[1], [0], [0], [1], [0, 0, 1, 1], [], []>} : vector<8x8xbf16>, vector<8x256xbf16>, vector<8x256xf32> -> vector<8x256xf32>
    %52 = arith.addf %45, %51 : vector<8x256xf32>
    %53 = vector.extract_strided_slice %25 {offsets = [0, 17], sizes = [8, 256], strides = [1, 1]} : vector<8x290xbf16> to vector<8x256xbf16>
    %c0_27 = arith.constant 0 : index
    %c4 = arith.constant 4 : index
    %c0_28 = arith.constant 0 : index
    %c0_29 = arith.constant 0 : index
    %54 = vector.load %arg2[%c0_27, %c4, %c0_28, %c0_29] : memref<2x9x8x8xbf16, #tpu.memory_space<vmem>>, vector<1x1x8x8xbf16>
    %55 = vector.shape_cast %54 : vector<1x1x8x8xbf16> to vector<8x8xbf16>
    %cst_30 = arith.constant dense<0.000000e+00> : vector<8x256xf32>
    %56 = tpu.matmul %55, %53, %cst_30 {dimension_numbers = #tpu.dot_dimension_numbers<[1], [0], [0], [1], [0, 0, 1, 1], [], []>} : vector<8x8xbf16>, vector<8x256xbf16>, vector<8x256xf32> -> vector<8x256xf32>
    %57 = arith.addf %52, %56 : vector<8x256xf32>
    %58 = vector.extract_strided_slice %25 {offsets = [0, 18], sizes = [8, 256], strides = [1, 1]} : vector<8x290xbf16> to vector<8x256xbf16>
    %cst_31 = arith.constant 0.000000e+00 : bf16
    %59 = vector.broadcast %cst_31 : bf16 to vector<8x256xbf16>
    %60 = arith.select %23, %58, %59 : vector<8x256xi1>, vector<8x256xbf16>
    %c0_32 = arith.constant 0 : index
    %c5 = arith.constant 5 : index
    %c0_33 = arith.constant 0 : index
    %c0_34 = arith.constant 0 : index
    %61 = vector.load %arg2[%c0_32, %c5, %c0_33, %c0_34] : memref<2x9x8x8xbf16, #tpu.memory_space<vmem>>, vector<1x1x8x8xbf16>
    %62 = vector.shape_cast %61 : vector<1x1x8x8xbf16> to vector<8x8xbf16>
    %cst_35 = arith.constant dense<0.000000e+00> : vector<8x256xf32>
    %63 = tpu.matmul %62, %60, %cst_35 {dimension_numbers = #tpu.dot_dimension_numbers<[1], [0], [0], [1], [0, 0, 1, 1], [], []>} : vector<8x8xbf16>, vector<8x256xbf16>, vector<8x256xf32> -> vector<8x256xf32>
    %64 = arith.addf %57, %63 : vector<8x256xf32>
    %65 = vector.extract_strided_slice %25 {offsets = [0, 32], sizes = [8, 256], strides = [1, 1]} : vector<8x290xbf16> to vector<8x256xbf16>
    %cst_36 = arith.constant 0.000000e+00 : bf16
    %66 = vector.broadcast %cst_36 : bf16 to vector<8x256xbf16>
    %67 = arith.select %21, %65, %66 : vector<8x256xi1>, vector<8x256xbf16>
    %c0_37 = arith.constant 0 : index
    %c6 = arith.constant 6 : index
    %c0_38 = arith.constant 0 : index
    %c0_39 = arith.constant 0 : index
    %68 = vector.load %arg2[%c0_37, %c6, %c0_38, %c0_39] : memref<2x9x8x8xbf16, #tpu.memory_space<vmem>>, vector<1x1x8x8xbf16>
    %69 = vector.shape_cast %68 : vector<1x1x8x8xbf16> to vector<8x8xbf16>
    %cst_40 = arith.constant dense<0.000000e+00> : vector<8x256xf32>
    %70 = tpu.matmul %69, %67, %cst_40 {dimension_numbers = #tpu.dot_dimension_numbers<[1], [0], [0], [1], [0, 0, 1, 1], [], []>} : vector<8x8xbf16>, vector<8x256xbf16>, vector<8x256xf32> -> vector<8x256xf32>
    %71 = arith.addf %64, %70 : vector<8x256xf32>
    %72 = vector.extract_strided_slice %25 {offsets = [0, 33], sizes = [8, 256], strides = [1, 1]} : vector<8x290xbf16> to vector<8x256xbf16>
    %c0_41 = arith.constant 0 : index
    %c7 = arith.constant 7 : index
    %c0_42 = arith.constant 0 : index
    %c0_43 = arith.constant 0 : index
    %73 = vector.load %arg2[%c0_41, %c7, %c0_42, %c0_43] : memref<2x9x8x8xbf16, #tpu.memory_space<vmem>>, vector<1x1x8x8xbf16>
    %74 = vector.shape_cast %73 : vector<1x1x8x8xbf16> to vector<8x8xbf16>
    %cst_44 = arith.constant dense<0.000000e+00> : vector<8x256xf32>
    %75 = tpu.matmul %74, %72, %cst_44 {dimension_numbers = #tpu.dot_dimension_numbers<[1], [0], [0], [1], [0, 0, 1, 1], [], []>} : vector<8x8xbf16>, vector<8x256xbf16>, vector<8x256xf32> -> vector<8x256xf32>
    %76 = arith.addf %71, %75 : vector<8x256xf32>
    %77 = vector.extract_strided_slice %25 {offsets = [0, 34], sizes = [8, 256], strides = [1, 1]} : vector<8x290xbf16> to vector<8x256xbf16>
    %cst_45 = arith.constant 0.000000e+00 : bf16
    %78 = vector.broadcast %cst_45 : bf16 to vector<8x256xbf16>
    %79 = arith.select %23, %77, %78 : vector<8x256xi1>, vector<8x256xbf16>
    %c0_46 = arith.constant 0 : index
    %c8 = arith.constant 8 : index
    %c0_47 = arith.constant 0 : index
    %c0_48 = arith.constant 0 : index
    %80 = vector.load %arg2[%c0_46, %c8, %c0_47, %c0_48] : memref<2x9x8x8xbf16, #tpu.memory_space<vmem>>, vector<1x1x8x8xbf16>
    %81 = vector.shape_cast %80 : vector<1x1x8x8xbf16> to vector<8x8xbf16>
    %cst_49 = arith.constant dense<0.000000e+00> : vector<8x256xf32>
    %82 = tpu.matmul %81, %79, %cst_49 {dimension_numbers = #tpu.dot_dimension_numbers<[1], [0], [0], [1], [0, 0, 1, 1], [], []>} : vector<8x8xbf16>, vector<8x256xbf16>, vector<8x256xf32> -> vector<8x256xf32>
    %83 = arith.addf %76, %82 : vector<8x256xf32>
    %c0_50 = arith.constant 0 : index
    %c0_51 = arith.constant 0 : index
    %c0_52 = arith.constant 0 : index
    %84 = vector.load %arg4[%c0_50, %c0_51, %c0_52] : memref<4x8x1xf32, #tpu.memory_space<vmem>>, vector<1x8x1xf32>
    %85 = vector.shape_cast %84 : vector<1x8x1xf32> to vector<8x1xf32>
    %c0_53 = arith.constant 0 : index
    %c0_54 = arith.constant 0 : index
    %c0_55 = arith.constant 0 : index
    %86 = vector.load %arg5[%c0_53, %c0_54, %c0_55] : memref<4x8x1xf32, #tpu.memory_space<vmem>>, vector<1x8x1xf32>
    %87 = vector.shape_cast %86 : vector<1x8x1xf32> to vector<8x1xf32>
    %cst_56 = arith.constant dense<0.000000e+00> : vector<8xf32>
    %88 = vector.multi_reduction <add>, %83, %cst_56 [1] : vector<8x256xf32> to vector<8xf32>
    %89 = vector.shape_cast %88 : vector<8xf32> to vector<8x1xf32>
    %cst_57 = arith.constant 3.906250e-03 : f32
    %90 = vector.broadcast %cst_57 : f32 to vector<8x1xf32>
    %91 = arith.mulf %89, %90 : vector<8x1xf32>
    %92 = vector.broadcast %91 : vector<8x1xf32> to vector<8x256xf32>
    %93 = arith.subf %83, %92 : vector<8x256xf32>
    %94 = arith.mulf %93, %93 : vector<8x256xf32>
    %cst_58 = arith.constant dense<0.000000e+00> : vector<8xf32>
    %95 = vector.multi_reduction <add>, %94, %cst_58 [1] : vector<8x256xf32> to vector<8xf32>
    %96 = vector.shape_cast %95 : vector<8xf32> to vector<8x1xf32>
    %cst_59 = arith.constant 3.906250e-03 : f32
    %97 = vector.broadcast %cst_59 : f32 to vector<8x1xf32>
    %98 = arith.mulf %96, %97 : vector<8x1xf32>
    %cst_60 = arith.constant 9.99999974E-6 : f32
    %99 = vector.broadcast %cst_60 : f32 to vector<8x1xf32>
    %100 = arith.addf %98, %99 : vector<8x1xf32>
    %101 = math.rsqrt %100 : vector<8x1xf32>
    %102 = arith.mulf %101, %85 : vector<8x1xf32>
    %103 = vector.broadcast %102 : vector<8x1xf32> to vector<8x256xf32>
    %104 = arith.mulf %93, %103 : vector<8x256xf32>
    %105 = vector.broadcast %87 : vector<8x1xf32> to vector<8x256xf32>
    %106 = arith.addf %104, %105 : vector<8x256xf32>
    %cst_61 = arith.constant 0.000000e+00 : f32
    %107 = vector.broadcast %cst_61 : f32 to vector<8x256xf32>
    %108 = arith.maximumf %106, %107 : vector<8x256xf32>
    %109 = arith.truncf %108 : vector<8x256xf32> to vector<8x256xbf16>
    %cst_62 = arith.constant 0.000000e+00 : bf16
    %110 = vector.broadcast %cst_62 : bf16 to vector<8x17xbf16>
    %111 = tpu.concatenate %110, %109, %110 in 1 : vector<8x17xbf16>, vector<8x256xbf16>, vector<8x17xbf16> -> vector<8x290xbf16>
    %cst_63 = arith.constant 0.000000e+00 : f32
    %112 = vector.broadcast %cst_63 : f32 to vector<8x256xf32>
    %113 = vector.extract_strided_slice %111 {offsets = [0, 0], sizes = [8, 256], strides = [1, 1]} : vector<8x290xbf16> to vector<8x256xbf16>
    %cst_64 = arith.constant 0.000000e+00 : bf16
    %114 = vector.broadcast %cst_64 : bf16 to vector<8x256xbf16>
    %115 = arith.select %21, %113, %114 : vector<8x256xi1>, vector<8x256xbf16>
    %c1_65 = arith.constant 1 : index
    %c0_66 = arith.constant 0 : index
    %c0_67 = arith.constant 0 : index
    %c0_68 = arith.constant 0 : index
    %116 = vector.load %arg2[%c1_65, %c0_66, %c0_67, %c0_68] : memref<2x9x8x8xbf16, #tpu.memory_space<vmem>>, vector<1x1x8x8xbf16>
    %117 = vector.shape_cast %116 : vector<1x1x8x8xbf16> to vector<8x8xbf16>
    %cst_69 = arith.constant dense<0.000000e+00> : vector<8x256xf32>
    %118 = tpu.matmul %117, %115, %cst_69 {dimension_numbers = #tpu.dot_dimension_numbers<[1], [0], [0], [1], [0, 0, 1, 1], [], []>} : vector<8x8xbf16>, vector<8x256xbf16>, vector<8x256xf32> -> vector<8x256xf32>
    %119 = arith.addf %112, %118 : vector<8x256xf32>
    %120 = vector.extract_strided_slice %111 {offsets = [0, 1], sizes = [8, 256], strides = [1, 1]} : vector<8x290xbf16> to vector<8x256xbf16>
    %c1_70 = arith.constant 1 : index
    %c1_71 = arith.constant 1 : index
    %c0_72 = arith.constant 0 : index
    %c0_73 = arith.constant 0 : index
    %121 = vector.load %arg2[%c1_70, %c1_71, %c0_72, %c0_73] : memref<2x9x8x8xbf16, #tpu.memory_space<vmem>>, vector<1x1x8x8xbf16>
    %122 = vector.shape_cast %121 : vector<1x1x8x8xbf16> to vector<8x8xbf16>
    %cst_74 = arith.constant dense<0.000000e+00> : vector<8x256xf32>
    %123 = tpu.matmul %122, %120, %cst_74 {dimension_numbers = #tpu.dot_dimension_numbers<[1], [0], [0], [1], [0, 0, 1, 1], [], []>} : vector<8x8xbf16>, vector<8x256xbf16>, vector<8x256xf32> -> vector<8x256xf32>
    %124 = arith.addf %119, %123 : vector<8x256xf32>
    %125 = vector.extract_strided_slice %111 {offsets = [0, 2], sizes = [8, 256], strides = [1, 1]} : vector<8x290xbf16> to vector<8x256xbf16>
    %cst_75 = arith.constant 0.000000e+00 : bf16
    %126 = vector.broadcast %cst_75 : bf16 to vector<8x256xbf16>
    %127 = arith.select %23, %125, %126 : vector<8x256xi1>, vector<8x256xbf16>
    %c1_76 = arith.constant 1 : index
    %c2_77 = arith.constant 2 : index
    %c0_78 = arith.constant 0 : index
    %c0_79 = arith.constant 0 : index
    %128 = vector.load %arg2[%c1_76, %c2_77, %c0_78, %c0_79] : memref<2x9x8x8xbf16, #tpu.memory_space<vmem>>, vector<1x1x8x8xbf16>
    %129 = vector.shape_cast %128 : vector<1x1x8x8xbf16> to vector<8x8xbf16>
    %cst_80 = arith.constant dense<0.000000e+00> : vector<8x256xf32>
    %130 = tpu.matmul %129, %127, %cst_80 {dimension_numbers = #tpu.dot_dimension_numbers<[1], [0], [0], [1], [0, 0, 1, 1], [], []>} : vector<8x8xbf16>, vector<8x256xbf16>, vector<8x256xf32> -> vector<8x256xf32>
    %131 = arith.addf %124, %130 : vector<8x256xf32>
    %132 = vector.extract_strided_slice %111 {offsets = [0, 16], sizes = [8, 256], strides = [1, 1]} : vector<8x290xbf16> to vector<8x256xbf16>
    %cst_81 = arith.constant 0.000000e+00 : bf16
    %133 = vector.broadcast %cst_81 : bf16 to vector<8x256xbf16>
    %134 = arith.select %21, %132, %133 : vector<8x256xi1>, vector<8x256xbf16>
    %c1_82 = arith.constant 1 : index
    %c3_83 = arith.constant 3 : index
    %c0_84 = arith.constant 0 : index
    %c0_85 = arith.constant 0 : index
    %135 = vector.load %arg2[%c1_82, %c3_83, %c0_84, %c0_85] : memref<2x9x8x8xbf16, #tpu.memory_space<vmem>>, vector<1x1x8x8xbf16>
    %136 = vector.shape_cast %135 : vector<1x1x8x8xbf16> to vector<8x8xbf16>
    %cst_86 = arith.constant dense<0.000000e+00> : vector<8x256xf32>
    %137 = tpu.matmul %136, %134, %cst_86 {dimension_numbers = #tpu.dot_dimension_numbers<[1], [0], [0], [1], [0, 0, 1, 1], [], []>} : vector<8x8xbf16>, vector<8x256xbf16>, vector<8x256xf32> -> vector<8x256xf32>
    %138 = arith.addf %131, %137 : vector<8x256xf32>
    %139 = vector.extract_strided_slice %111 {offsets = [0, 17], sizes = [8, 256], strides = [1, 1]} : vector<8x290xbf16> to vector<8x256xbf16>
    %c1_87 = arith.constant 1 : index
    %c4_88 = arith.constant 4 : index
    %c0_89 = arith.constant 0 : index
    %c0_90 = arith.constant 0 : index
    %140 = vector.load %arg2[%c1_87, %c4_88, %c0_89, %c0_90] : memref<2x9x8x8xbf16, #tpu.memory_space<vmem>>, vector<1x1x8x8xbf16>
    %141 = vector.shape_cast %140 : vector<1x1x8x8xbf16> to vector<8x8xbf16>
    %cst_91 = arith.constant dense<0.000000e+00> : vector<8x256xf32>
    %142 = tpu.matmul %141, %139, %cst_91 {dimension_numbers = #tpu.dot_dimension_numbers<[1], [0], [0], [1], [0, 0, 1, 1], [], []>} : vector<8x8xbf16>, vector<8x256xbf16>, vector<8x256xf32> -> vector<8x256xf32>
    %143 = arith.addf %138, %142 : vector<8x256xf32>
    %144 = vector.extract_strided_slice %111 {offsets = [0, 18], sizes = [8, 256], strides = [1, 1]} : vector<8x290xbf16> to vector<8x256xbf16>
    %cst_92 = arith.constant 0.000000e+00 : bf16
    %145 = vector.broadcast %cst_92 : bf16 to vector<8x256xbf16>
    %146 = arith.select %23, %144, %145 : vector<8x256xi1>, vector<8x256xbf16>
    %c1_93 = arith.constant 1 : index
    %c5_94 = arith.constant 5 : index
    %c0_95 = arith.constant 0 : index
    %c0_96 = arith.constant 0 : index
    %147 = vector.load %arg2[%c1_93, %c5_94, %c0_95, %c0_96] : memref<2x9x8x8xbf16, #tpu.memory_space<vmem>>, vector<1x1x8x8xbf16>
    %148 = vector.shape_cast %147 : vector<1x1x8x8xbf16> to vector<8x8xbf16>
    %cst_97 = arith.constant dense<0.000000e+00> : vector<8x256xf32>
    %149 = tpu.matmul %148, %146, %cst_97 {dimension_numbers = #tpu.dot_dimension_numbers<[1], [0], [0], [1], [0, 0, 1, 1], [], []>} : vector<8x8xbf16>, vector<8x256xbf16>, vector<8x256xf32> -> vector<8x256xf32>
    %150 = arith.addf %143, %149 : vector<8x256xf32>
    %151 = vector.extract_strided_slice %111 {offsets = [0, 32], sizes = [8, 256], strides = [1, 1]} : vector<8x290xbf16> to vector<8x256xbf16>
    %cst_98 = arith.constant 0.000000e+00 : bf16
    %152 = vector.broadcast %cst_98 : bf16 to vector<8x256xbf16>
    %153 = arith.select %21, %151, %152 : vector<8x256xi1>, vector<8x256xbf16>
    %c1_99 = arith.constant 1 : index
    %c6_100 = arith.constant 6 : index
    %c0_101 = arith.constant 0 : index
    %c0_102 = arith.constant 0 : index
    %154 = vector.load %arg2[%c1_99, %c6_100, %c0_101, %c0_102] : memref<2x9x8x8xbf16, #tpu.memory_space<vmem>>, vector<1x1x8x8xbf16>
    %155 = vector.shape_cast %154 : vector<1x1x8x8xbf16> to vector<8x8xbf16>
    %cst_103 = arith.constant dense<0.000000e+00> : vector<8x256xf32>
    %156 = tpu.matmul %155, %153, %cst_103 {dimension_numbers = #tpu.dot_dimension_numbers<[1], [0], [0], [1], [0, 0, 1, 1], [], []>} : vector<8x8xbf16>, vector<8x256xbf16>, vector<8x256xf32> -> vector<8x256xf32>
    %157 = arith.addf %150, %156 : vector<8x256xf32>
    %158 = vector.extract_strided_slice %111 {offsets = [0, 33], sizes = [8, 256], strides = [1, 1]} : vector<8x290xbf16> to vector<8x256xbf16>
    %c1_104 = arith.constant 1 : index
    %c7_105 = arith.constant 7 : index
    %c0_106 = arith.constant 0 : index
    %c0_107 = arith.constant 0 : index
    %159 = vector.load %arg2[%c1_104, %c7_105, %c0_106, %c0_107] : memref<2x9x8x8xbf16, #tpu.memory_space<vmem>>, vector<1x1x8x8xbf16>
    %160 = vector.shape_cast %159 : vector<1x1x8x8xbf16> to vector<8x8xbf16>
    %cst_108 = arith.constant dense<0.000000e+00> : vector<8x256xf32>
    %161 = tpu.matmul %160, %158, %cst_108 {dimension_numbers = #tpu.dot_dimension_numbers<[1], [0], [0], [1], [0, 0, 1, 1], [], []>} : vector<8x8xbf16>, vector<8x256xbf16>, vector<8x256xf32> -> vector<8x256xf32>
    %162 = arith.addf %157, %161 : vector<8x256xf32>
    %163 = vector.extract_strided_slice %111 {offsets = [0, 34], sizes = [8, 256], strides = [1, 1]} : vector<8x290xbf16> to vector<8x256xbf16>
    %cst_109 = arith.constant 0.000000e+00 : bf16
    %164 = vector.broadcast %cst_109 : bf16 to vector<8x256xbf16>
    %165 = arith.select %23, %163, %164 : vector<8x256xi1>, vector<8x256xbf16>
    %c1_110 = arith.constant 1 : index
    %c8_111 = arith.constant 8 : index
    %c0_112 = arith.constant 0 : index
    %c0_113 = arith.constant 0 : index
    %166 = vector.load %arg2[%c1_110, %c8_111, %c0_112, %c0_113] : memref<2x9x8x8xbf16, #tpu.memory_space<vmem>>, vector<1x1x8x8xbf16>
    %167 = vector.shape_cast %166 : vector<1x1x8x8xbf16> to vector<8x8xbf16>
    %cst_114 = arith.constant dense<0.000000e+00> : vector<8x256xf32>
    %168 = tpu.matmul %167, %165, %cst_114 {dimension_numbers = #tpu.dot_dimension_numbers<[1], [0], [0], [1], [0, 0, 1, 1], [], []>} : vector<8x8xbf16>, vector<8x256xbf16>, vector<8x256xf32> -> vector<8x256xf32>
    %169 = arith.addf %162, %168 : vector<8x256xf32>
    %c1_115 = arith.constant 1 : index
    %c0_116 = arith.constant 0 : index
    %c0_117 = arith.constant 0 : index
    %170 = vector.load %arg4[%c1_115, %c0_116, %c0_117] : memref<4x8x1xf32, #tpu.memory_space<vmem>>, vector<1x8x1xf32>
    %171 = vector.shape_cast %170 : vector<1x8x1xf32> to vector<8x1xf32>
    %c1_118 = arith.constant 1 : index
    %c0_119 = arith.constant 0 : index
    %c0_120 = arith.constant 0 : index
    %172 = vector.load %arg5[%c1_118, %c0_119, %c0_120] : memref<4x8x1xf32, #tpu.memory_space<vmem>>, vector<1x8x1xf32>
    %173 = vector.shape_cast %172 : vector<1x8x1xf32> to vector<8x1xf32>
    %cst_121 = arith.constant dense<0.000000e+00> : vector<8xf32>
    %174 = vector.multi_reduction <add>, %169, %cst_121 [1] : vector<8x256xf32> to vector<8xf32>
    %175 = vector.shape_cast %174 : vector<8xf32> to vector<8x1xf32>
    %cst_122 = arith.constant 3.906250e-03 : f32
    %176 = vector.broadcast %cst_122 : f32 to vector<8x1xf32>
    %177 = arith.mulf %175, %176 : vector<8x1xf32>
    %178 = vector.broadcast %177 : vector<8x1xf32> to vector<8x256xf32>
    %179 = arith.subf %169, %178 : vector<8x256xf32>
    %180 = arith.mulf %179, %179 : vector<8x256xf32>
    %cst_123 = arith.constant dense<0.000000e+00> : vector<8xf32>
    %181 = vector.multi_reduction <add>, %180, %cst_123 [1] : vector<8x256xf32> to vector<8xf32>
    %182 = vector.shape_cast %181 : vector<8xf32> to vector<8x1xf32>
    %cst_124 = arith.constant 3.906250e-03 : f32
    %183 = vector.broadcast %cst_124 : f32 to vector<8x1xf32>
    %184 = arith.mulf %182, %183 : vector<8x1xf32>
    %cst_125 = arith.constant 9.99999974E-6 : f32
    %185 = vector.broadcast %cst_125 : f32 to vector<8x1xf32>
    %186 = arith.addf %184, %185 : vector<8x1xf32>
    %187 = math.rsqrt %186 : vector<8x1xf32>
    %188 = arith.mulf %187, %171 : vector<8x1xf32>
    %189 = vector.broadcast %188 : vector<8x1xf32> to vector<8x256xf32>
    %190 = arith.mulf %179, %189 : vector<8x256xf32>
    %191 = vector.broadcast %173 : vector<8x1xf32> to vector<8x256xf32>
    %192 = arith.addf %190, %191 : vector<8x256xf32>
    %cst_126 = arith.constant 0.000000e+00 : f32
    %193 = vector.broadcast %cst_126 : f32 to vector<8x256xf32>
    %194 = arith.maximumf %192, %193 : vector<8x256xf32>
    %c0_127 = arith.constant 0 : index
    %c0_128 = arith.constant 0 : index
    %c0_129 = arith.constant 0 : index
    %195 = vector.load %arg3[%c0_127, %c0_128, %c0_129] : memref<2x8x8xbf16, #tpu.memory_space<vmem>>, vector<1x8x8xbf16>
    %196 = vector.shape_cast %195 : vector<1x8x8xbf16> to vector<8x8xbf16>
    %cst_130 = arith.constant dense<0.000000e+00> : vector<8x256xf32>
    %197 = tpu.matmul %196, %2, %cst_130 {dimension_numbers = #tpu.dot_dimension_numbers<[1], [0], [0], [1], [0, 0, 1, 1], [], []>} : vector<8x8xbf16>, vector<8x256xbf16>, vector<8x256xf32> -> vector<8x256xf32>
    %c2_131 = arith.constant 2 : index
    %c0_132 = arith.constant 0 : index
    %c0_133 = arith.constant 0 : index
    %198 = vector.load %arg4[%c2_131, %c0_132, %c0_133] : memref<4x8x1xf32, #tpu.memory_space<vmem>>, vector<1x8x1xf32>
    %199 = vector.shape_cast %198 : vector<1x8x1xf32> to vector<8x1xf32>
    %c2_134 = arith.constant 2 : index
    %c0_135 = arith.constant 0 : index
    %c0_136 = arith.constant 0 : index
    %200 = vector.load %arg5[%c2_134, %c0_135, %c0_136] : memref<4x8x1xf32, #tpu.memory_space<vmem>>, vector<1x8x1xf32>
    %201 = vector.shape_cast %200 : vector<1x8x1xf32> to vector<8x1xf32>
    %cst_137 = arith.constant dense<0.000000e+00> : vector<8xf32>
    %202 = vector.multi_reduction <add>, %197, %cst_137 [1] : vector<8x256xf32> to vector<8xf32>
    %203 = vector.shape_cast %202 : vector<8xf32> to vector<8x1xf32>
    %cst_138 = arith.constant 3.906250e-03 : f32
    %204 = vector.broadcast %cst_138 : f32 to vector<8x1xf32>
    %205 = arith.mulf %203, %204 : vector<8x1xf32>
    %206 = vector.broadcast %205 : vector<8x1xf32> to vector<8x256xf32>
    %207 = arith.subf %197, %206 : vector<8x256xf32>
    %208 = arith.mulf %207, %207 : vector<8x256xf32>
    %cst_139 = arith.constant dense<0.000000e+00> : vector<8xf32>
    %209 = vector.multi_reduction <add>, %208, %cst_139 [1] : vector<8x256xf32> to vector<8xf32>
    %210 = vector.shape_cast %209 : vector<8xf32> to vector<8x1xf32>
    %cst_140 = arith.constant 3.906250e-03 : f32
    %211 = vector.broadcast %cst_140 : f32 to vector<8x1xf32>
    %212 = arith.mulf %210, %211 : vector<8x1xf32>
    %cst_141 = arith.constant 9.99999974E-6 : f32
    %213 = vector.broadcast %cst_141 : f32 to vector<8x1xf32>
    %214 = arith.addf %212, %213 : vector<8x1xf32>
    %215 = math.rsqrt %214 : vector<8x1xf32>
    %216 = arith.mulf %215, %199 : vector<8x1xf32>
    %217 = vector.broadcast %216 : vector<8x1xf32> to vector<8x256xf32>
    %218 = arith.mulf %207, %217 : vector<8x256xf32>
    %219 = vector.broadcast %201 : vector<8x1xf32> to vector<8x256xf32>
    %220 = arith.addf %218, %219 : vector<8x256xf32>
    %cst_142 = arith.constant 0.000000e+00 : f32
    %221 = vector.broadcast %cst_142 : f32 to vector<8x256xf32>
    %222 = arith.maximumf %220, %221 : vector<8x256xf32>
    %223 = arith.addf %194, %222 : vector<8x256xf32>
    %c1_143 = arith.constant 1 : index
    %c0_144 = arith.constant 0 : index
    %c0_145 = arith.constant 0 : index
    %224 = vector.load %arg3[%c1_143, %c0_144, %c0_145] : memref<2x8x8xbf16, #tpu.memory_space<vmem>>, vector<1x8x8xbf16>
    %225 = vector.shape_cast %224 : vector<1x8x8xbf16> to vector<8x8xbf16>
    %226 = arith.truncf %223 : vector<8x256xf32> to vector<8x256xbf16>
    %cst_146 = arith.constant dense<0.000000e+00> : vector<8x256xf32>
    %227 = tpu.matmul %225, %226, %cst_146 {dimension_numbers = #tpu.dot_dimension_numbers<[1], [0], [0], [1], [0, 0, 1, 1], [], []>} : vector<8x8xbf16>, vector<8x256xbf16>, vector<8x256xf32> -> vector<8x256xf32>
    %c3_147 = arith.constant 3 : index
    %c0_148 = arith.constant 0 : index
    %c0_149 = arith.constant 0 : index
    %228 = vector.load %arg4[%c3_147, %c0_148, %c0_149] : memref<4x8x1xf32, #tpu.memory_space<vmem>>, vector<1x8x1xf32>
    %229 = vector.shape_cast %228 : vector<1x8x1xf32> to vector<8x1xf32>
    %c3_150 = arith.constant 3 : index
    %c0_151 = arith.constant 0 : index
    %c0_152 = arith.constant 0 : index
    %230 = vector.load %arg5[%c3_150, %c0_151, %c0_152] : memref<4x8x1xf32, #tpu.memory_space<vmem>>, vector<1x8x1xf32>
    %231 = vector.shape_cast %230 : vector<1x8x1xf32> to vector<8x1xf32>
    %cst_153 = arith.constant dense<0.000000e+00> : vector<8xf32>
    %232 = vector.multi_reduction <add>, %227, %cst_153 [1] : vector<8x256xf32> to vector<8xf32>
    %233 = vector.shape_cast %232 : vector<8xf32> to vector<8x1xf32>
    %cst_154 = arith.constant 3.906250e-03 : f32
    %234 = vector.broadcast %cst_154 : f32 to vector<8x1xf32>
    %235 = arith.mulf %233, %234 : vector<8x1xf32>
    %236 = vector.broadcast %235 : vector<8x1xf32> to vector<8x256xf32>
    %237 = arith.subf %227, %236 : vector<8x256xf32>
    %238 = arith.mulf %237, %237 : vector<8x256xf32>
    %cst_155 = arith.constant dense<0.000000e+00> : vector<8xf32>
    %239 = vector.multi_reduction <add>, %238, %cst_155 [1] : vector<8x256xf32> to vector<8xf32>
    %240 = vector.shape_cast %239 : vector<8xf32> to vector<8x1xf32>
    %cst_156 = arith.constant 3.906250e-03 : f32
    %241 = vector.broadcast %cst_156 : f32 to vector<8x1xf32>
    %242 = arith.mulf %240, %241 : vector<8x1xf32>
    %cst_157 = arith.constant 9.99999974E-6 : f32
    %243 = vector.broadcast %cst_157 : f32 to vector<8x1xf32>
    %244 = arith.addf %242, %243 : vector<8x1xf32>
    %245 = math.rsqrt %244 : vector<8x1xf32>
    %246 = arith.mulf %245, %229 : vector<8x1xf32>
    %247 = vector.broadcast %246 : vector<8x1xf32> to vector<8x256xf32>
    %248 = arith.mulf %237, %247 : vector<8x256xf32>
    %249 = vector.broadcast %231 : vector<8x1xf32> to vector<8x256xf32>
    %250 = arith.addf %248, %249 : vector<8x256xf32>
    %cst_158 = arith.constant 0.000000e+00 : f32
    %251 = vector.broadcast %cst_158 : f32 to vector<8x256xf32>
    %252 = arith.maximumf %250, %251 : vector<8x256xf32>
    %253 = arith.addf %252, %1 : vector<8x256xf32>
    %c0_159 = arith.constant 0 : index
    %c0_160 = arith.constant 0 : index
    %c0_161 = arith.constant 0 : index
    %254 = vector.load %arg6[%c0_159, %c0_160, %c0_161] : memref<1x8x256xf32, #tpu.memory_space<vmem>>, vector<1x8x256xf32>
    %255 = vector.shape_cast %254 : vector<1x8x256xf32> to vector<8x256xf32>
    %256 = vector.shape_cast %253 : vector<8x256xf32> to vector<1x8x256xf32>
    tpu.vector_store %arg6[%c0_159, %c0_160, %c0_161], %256 {strides = array<i32>} : memref<1x8x256xf32, #tpu.memory_space<vmem>>, vector<1x8x256xf32>,
    return
  }
  func.func @transform_0(%arg0: i32) -> (i32, i32, i32) {
    %c0_i32 = arith.constant 0 : i32
    %c0_i32_0 = arith.constant 0 : i32
    %c0_i32_1 = arith.constant 0 : i32
    return %arg0, %c0_i32, %c0_i32_0 : i32, i32, i32
  }
  func.func @transform_1(%arg0: i32) -> (i32, i32, i32, i32) {
    %c0_i32 = arith.constant 0 : i32
    %c0_i32_0 = arith.constant 0 : i32
    %c0_i32_1 = arith.constant 0 : i32
    %c0_i32_2 = arith.constant 0 : i32
    %c0_i32_3 = arith.constant 0 : i32
    return %c0_i32, %c0_i32_0, %c0_i32_1, %c0_i32_2 : i32, i32, i32, i32
  }
  func.func @transform_2(%arg0: i32) -> (i32, i32, i32) {
    %c0_i32 = arith.constant 0 : i32
    %c0_i32_0 = arith.constant 0 : i32
    %c0_i32_1 = arith.constant 0 : i32
    %c0_i32_2 = arith.constant 0 : i32
    return %c0_i32, %c0_i32_0, %c0_i32_1 : i32, i32, i32
  }
  func.func @transform_3(%arg0: i32) -> (i32, i32, i32) {
    %c0_i32 = arith.constant 0 : i32
    %c0_i32_0 = arith.constant 0 : i32
    %c0_i32_1 = arith.constant 0 : i32
    %c0_i32_2 = arith.constant 0 : i32
    return %c0_i32, %c0_i32_0, %c0_i32_1 : i32, i32, i32
  }
  func.func @transform_4(%arg0: i32) -> (i32, i32, i32) {
    %c0_i32 = arith.constant 0 : i32
    %c0_i32_0 = arith.constant 0 : i32
    %c0_i32_1 = arith.constant 0 : i32
    %c0_i32_2 = arith.constant 0 : i32
    return %c0_i32, %c0_i32_0, %c0_i32_1 : i32, i32, i32
  }
  func.func @transform_5(%arg0: i32) -> (i32, i32, i32) {
    %c0_i32 = arith.constant 0 : i32
    %c0_i32_0 = arith.constant 0 : i32
    %c0_i32_1 = arith.constant 0 : i32
    return %arg0, %c0_i32, %c0_i32_0 : i32, i32, i32
  }
}

</mosaic_0001>

<bundles_post_ra>
// kernel: tpu_custom_call.1
= control target key start
LH: loop header
LB: loop body
LE: loop exit
PB: predicated region body
PF: predicated region fallthrough
CT: control target
= control target key end

     0   :  { %10 = vsyncpa [#allocation3], 0  ;;  %s2748_s0 = inlined_call_operand.vmem [shape: f32[2,8,256], index: 0, kind: input, shape index: {}]   ;;  %s2749_s1 = inlined_call_operand.vmem [shape: bf16[2,9,8,8], index: 1, kind: input, shape index: {}]   ;;  %s2750_s2 = inlined_call_operand.vmem [shape: bf16[2,8,8], index: 2, kind: input, shape index: {}]   ;;  %s2751_s3 = inlined_call_operand.vmem [shape: f32[4,8,1], index: 3, kind: input, shape index: {}]   ;;  %s2752_s4 = inlined_call_operand.vmem [shape: f32[4,8,1], index: 4, kind: input, shape index: {}]   ;;  %s2753_s5 = inlined_call_operand.hbm [shape: f32[2,8,256], index: 5, kind: output, shape index: {}]  }
   0x1   :  { %12 = vsyncpa [#allocation3 + $0x1], 0  ;;  %s1939_s18 = smov 0   ;;  %s1941_s19 = smov 0  }
   0x2   :  { %s1943_s20 = smov 0   ;;  %s1945_s21 = smov 0  }
   0x3 LB: > { %s1960_s22 = sadd.s32 4294967295, %s1892_s21   ;;  %s1685_s23 = sadd.s32 4294967294, %s1892_s21   ;;  %s1892_s21 = sphi %s1945_s21, %s3001_s21   ;;  %s1888_s20 = sphi %s1943_s20, %s3000_s20   ;;  %s1884_s19 = sphi %s1941_s19, %s2999_s19   ;;  %s1880_s18 = sphi %s1939_s18, %s2998_s18  }
   0x4   : > { %s1964_s24 = sadd.s32 1, %s1892_s21   ;;  %s135_s25 = sadd.s32 1, %s1888_s20 }
   0x5   : > { %s132_s26 = ssub.s32 %s1892_s21, %s1964_s24  ;;  %p145_p0 = scmp.ne.s32.totalorder %s1888_s20, %s1884_s19 }
   0x6   : > { %p133_p1 = scmp.eq.s32.totalorder %s132_s26, 0  ;;  %p146_p2 = scmp.eq.s32.totalorder %s1960_s22, 1 }
   0x7   : > { %p151_p3 = scmp.ne.s32.totalorder %s1884_s19, %s1880_s18  ;;  %p152_p4 = scmp.eq.s32.totalorder %s1685_s23, 1 }
   0x8   : > { %s1975_s27 = scalar_select %p133_p1, %s1888_s20, %s135_s25  }
   0x9   : > { %p1977_p5 = por %p146_p2, %p145_p0  ;;  %p1981_p6 = por %p152_p4, %p151_p3 }
   0xa   : > { %p1688_p7 = scmp.ge.s32.totalorder %s1892_s21, 1  ;;  %p190_p8 = scmp.lt.s32.totalorder %s1892_s21, 3 }
   0xc   : > { %p191_p9 = pnand %p1688_p7, %p190_p8 }
   0xd   : > { %p218_p10 = scmp.lt.s32.totalorder (!%p191_p9), %s1960_s22, 1  ;;  %s1895_s10 = smov (!%p191_p9), 2  }
   0xe   : > { %194 = sbr.rel (%p191_p9) target bundleno = 2251 (0x8cb), region = 40  ;;  %s1896_s11 = smov (!%p191_p9), 17  }
   0xf   : > { %s1897_s12 = smov (!%p191_p9), 16   ;;  %s1898_s13 = smov (!%p191_p9), 18  }
  0x10   : > { %s1899_s14 = smov (!%p191_p9), 32   ;;  %s1900_s15 = smov (!%p191_p9), 127  }
  0x11   : > { %s1901_s16 = smov (!%p191_p9), 34   ;;  %s1902_s17 = smov (!%p191_p9), 126  }
  0x12   : > { %s1903_s23 = smov (!%p191_p9), 112   ;;  %s1904_s25 = smov (!%p191_p9), 111  }
  0x13   : > { %v229_v0 = vlaneseq  ;;  %v1894_v1 = vmov 0   ;;  %s219_s30 = scalar_select %p218_p10, %s1960_s22, 1  ;;  %vm2757_vm8 = vcmask 138240   ;;  %vm2758_vm10 = vcmask 1043456  }
  0x14   : > { %1817 = vset.pattern.permute.xlu2 %v1894_v1  ;;  %1819 = vset.pattern.permute.xlu0 %v1894_v1  ;;  %v2009_v19 = vunpack.c.l.b16 %v1894_v1  ;;  %v2011_v20 = vunpack.c.h.b16 %v1894_v1  ;;  %v2811_v33 = vmov 0  ;;  %v2813_v34 = vmov 0  ;;  %s1905_s26 = smov 110  }
  0x15   : > { %v230_v2 = vand.u32 127, %v229_v0  ;;  %1818 = vset.pattern.permute.xlu1 %v1894_v1  ;;  %s1761_s6 = sshll.u32 %s219_s30, 4  ;;  %vm394_vm13 = vcmask 15360   ;;  %v2815_v44 = vmov 0  ;;  %v2817_v45 = vmov 0  ;;  %s1906_s30 = smov 96  }
  0x16   : > { %s1992_s9 = scalar_lea.vmem %s2748_s0, %s1761_s6  ;;  %v2823_v56 = vmov 0  ;;  %v2825_v57 = vmov 0  ;;  %s1907_s6 = smov 95  }
  0x17   : > { %v231_v3 = vadd.s32 128, %v230_v2  ;;  %v236_v4 = vand.u32 15, %v230_v2  ;;  %v226_v6 = vld [vmem:[%s1992_s9] sm:$0xff]  ;;  %v227_v7 = vld [vmem:[%s1992_s9 + $0x8] sm:$0xff] }
  0x18   : > { %v228_v8 = vpack.c.bf16 %v227_v7, %v226_v6  ;;  %v2835_v7 = vmov 0 }
  0x19   : > { %v243_v5 = vand.u32 15, %v231_v3  ;;  %vm258_vm0 = vcmp.le.s32.totalorder %v236_v4, 14  ;;  %vm256_vm1 = vcmp.ge.s32.totalorder %v236_v4, 1  ;;  %v2831_v4 = vmov 0 }
  0x1a   : > { %v261_v9 = vunpack.c.l.b16 %v228_v8  ;;  %v262_v15 = vunpack.c.h.b16 %v228_v8  ;;  %v2837_v8 = vmov 0 }
  0x1b   : > { %vm259_vm2 = vcmp.le.s32.totalorder %v243_v5, 14  ;;  %vm257_vm3 = vcmp.ge.s32.totalorder %v243_v5, 1  ;;  %v2833_v5 = vmov 0 }
  0x1c   : > { %vm386_vm4 = vmpackc.low %vm259_vm2, %vm258_vm0  ;;  %v1998_v12 = vpack.c.b16 %v261_v9, %v261_v9  ;;  %v2003_v17 = vpack.c.b16 %v262_v15, %v262_v15  ;;  %vm475_vm2 = vcmask 130048   ;;  %v2839_v15 = vmov 0 }
  0x1d   : > { %v387_v10 = vsel %vm386_vm4, 65537, %v1894_v1  ;;  %vm280_vm5 = vmpackc.low %vm257_vm3, %vm256_vm1 }
  0x1e   : > { %v1996_v11 = vperm.slane %v387_v10, 0  ;;  %v281_v13 = vsel %vm280_vm5, 65537, %v1894_v1  ;;  %265 = vrot.lane.b32.xlu0 %v1998_v12, %s1896_s11  ;;  %v389_v16 = vperm.slane %v387_v10, 4 }
  0x1f   : > { %v282_v14 = vperm.slane %v281_v13, 0  ;;  %v283_v18 = vperm.slane %v281_v13, 4 }
  0x20   : > { %390 = vrot.lane.b32.xlu1 %v1996_v11, %s1895_s10 }
  0x21   : > { %471 = vrot.lane.b32.xlu2 %v282_v14, %s1897_s12  ;;  %v284_v21 = vunpack.c.l.b16 %v282_v14  ;;  %v285_v22 = vunpack.c.h.b16 %v282_v14  ;;  %v291_v27 = vunpack.c.l.b16 %v283_v18  ;;  %v292_v28 = vunpack.c.h.b16 %v283_v18 }
  0x23   : > { %vm2014_vm6 = vcmp.ne.s32.totalorder %v284_v21, %v2009_v19  ;;  %vm2019_vm7 = vcmp.ne.s32.totalorder %v285_v22, %v2011_v20  ;;  %vm2040_vm11 = vcmp.ne.s32.totalorder %v291_v27, %v2009_v19  ;;  %vm2045_vm12 = vcmp.ne.s32.totalorder %v292_v28, %v2011_v20 }
  0x24   : > { %vm2756_vm9 = vmpackc.low %vm2019_vm7, %vm2014_vm6  ;;  %v2812_v33 = vsel %vm2040_vm11, 4294967295, %v2811_v33  ;;  %v2814_v34 = vsel %vm2045_vm12, 4294967295, %v2813_v34  ;;  %v2843_v28 = vmov 0 }
  0x25   : > { %vm2755_vm14 = vmpackc.low %vm2045_vm12, %vm2040_vm11  ;;  %vm2792_vm12 = vcmask 1031168  }
  0x26   : > { %267 = vrot.lane.b32.xlu0 %v2003_v17, %s1896_s11 }
  0x28   : > { %392 = vrot.lane.b32.xlu1 %v389_v16, %s1895_s10 }
  0x29   : > { %473 = vrot.lane.b32.xlu2 %v283_v18, %s1897_s12 }
  0x2e   : > { %600 = vrot.lane.b32.xlu0 %v1996_v11, %s1898_s13 }
  0x30   : > { %602 = vrot.lane.b32.xlu1 %v389_v16, %s1898_s13  ;;  %s1908_s13 = smov 94  }
  0x31   : > { %681 = vrot.lane.b32.xlu2 %v282_v14, %s1899_s14 }
  0x7b   : > { %v472_v31 = vpop.permute.xlu2 %471 }
  0x7c   : > { %v477_v61 = vunpack.c.l.b16 %v472_v31  ;;  %v478_v62 = vunpack.c.h.b16 %v472_v31 }
  0x83   : > { %v474_v46 = vpop.permute.xlu2 %473 }
  0x84   : > { %v491_v47 = vunpack.c.l.b16 %v474_v46  ;;  %v492_v48 = vunpack.c.h.b16 %v474_v46  ;;  %v476_v60 = vsel %vm475_vm2, %v472_v31, %v474_v46  ;;  %vm2157_vm2 = vcmp.ne.s32.totalorder %v477_v61, %v2009_v19  ;;  %v1692_v61 = vld [vmem:[%s2749_s1 + $0x4] sm:$0xf] }
  0x85   : > { %v484_v63 = vunpack.c.l.b16 %v476_v60  ;;  %v485_v0 = vunpack.c.h.b16 %v476_v60  ;;  %v2832_v4 = vsel %vm2157_vm2, 4294967295, %v2831_v4 }
  0x86   : > { %vm2093_vm3 = vcmp.ne.s32.totalorder %v491_v47, %v2009_v19  ;;  %vm2098_vm4 = vcmp.ne.s32.totalorder %v492_v48, %v2011_v20 }
  0x8b   : > { %v682_v31 = vpop.permute.xlu2 %681 }
  0x90   : > { %v266_v26 = vpop.permute.xlu0 %265 }
  0x91   : > { %v2028_v29 = vsel %vm2757_vm8, 0, %v266_v26 }
  0x92   : > { %v391_v25 = vpop.permute.xlu1 %390  ;;  %305 = vrot.lane.b32.xlu2 %v2028_v29, %s1900_s15  ;;  %v298_v30 = vsel %vm2756_vm9, %v2028_v29, 0  ;;  %vm2760_vm9 = vmpackc.low %vm2098_vm4, %vm2093_vm3 }
  0x93   : > { %v355_v32 = vsel %vm2758_vm10, %v298_v30, 0  ;;  %v396_v51 = vunpack.c.l.b16 %v391_v25  ;;  %v397_v52 = vunpack.c.h.b16 %v391_v25  ;;  %v2845_v30 = vmov 0 }
  0x94   : > { %367 = vmatpush.bf16.msra.mxu2 %v355_v32  ;;  %v2847_v32 = vmov 0 }
  0x98   : > { %v268_v36 = vpop.permute.xlu0 %267 }
  0x99   : > { %v2054_v38 = vsel %vm2757_vm8, %v266_v26, %v268_v36  ;;  %v2057_v41 = vsel %vm2757_vm8, %v268_v36, 0  ;;  %v687_v36 = vunpack.c.l.b16 %v682_v31 }
  0x9a   : > { %v393_v35 = vpop.permute.xlu1 %392  ;;  %812 = vrot.lane.b32.xlu2 %v389_v16, %s1901_s16  ;;  %307 = vrot.lane.b32.xlu0 %v2054_v38, %s1900_s15  ;;  %v299_v42 = vsel %vm2755_vm14, %v2054_v38, 0  ;;  %vm2119_vm14 = vcmp.ne.s32.totalorder %v397_v52, %v2011_v20  ;;  %v500_v2 = vsel %vm2760_vm9, %v2057_v41, 0  ;;  %vm2167_vm9 = vcmp.ne.s32.totalorder %v484_v63, %v2009_v19 }
  0x9b   : > { %v395_v37 = vsel %vm394_vm13, %v391_v25, %v393_v35  ;;  %309 = vrot.lane.b32.xlu1 %v2057_v41, %s1900_s15  ;;  %v358_v43 = vsel %vm2758_vm10, %v299_v42, 0  ;;  %v410_v49 = vunpack.c.l.b16 %v393_v35  ;;  %v411_v50 = vunpack.c.h.b16 %v393_v35 }
  0x9c   : > { %v403_v39 = vunpack.c.l.b16 %v395_v37  ;;  %v404_v40 = vunpack.c.h.b16 %v395_v37  ;;  %380 = vmatpush.bf16.msra.mxu3 %v358_v43  ;;  %v2836_v7 = vsel %vm2167_vm9, 4294967295, %v2835_v7  ;;  %v2841_v16 = vmov 0 }
  0x9d   : > { %vm2104_vm5 = vcmp.ne.s32.totalorder %v410_v49, %v2009_v19  ;;  %vm2109_vm13 = vcmp.ne.s32.totalorder %v411_v50, %v2011_v20  ;;  %v2849_v35 = vmov 0  ;;  %v688_v37 = vunpack.c.h.b16 %v682_v31 }
  0x9e   : > { %vm2071_vm15 = vcmp.ne.s32.totalorder %v403_v39, %v2009_v19  ;;  %vm2076_vm0 = vcmp.ne.s32.totalorder %v404_v40, %v2011_v20  ;;  %v2824_v56 = vsel %vm2104_vm5, 4294967295, %v2823_v56  ;;  %v2826_v57 = vsel %vm2109_vm13, 4294967295, %v2825_v57  ;;  %vm2759_vm8 = vmpackc.low %vm2109_vm13, %vm2104_vm5 }
  0x9f   : > { %v2816_v44 = vsel %vm2071_vm15, 4294967295, %v2815_v44  ;;  %v2818_v45 = vsel %vm2076_vm0, 4294967295, %v2817_v45  ;;  %vm2754_vm1 = vmpackc.low %vm2076_vm0, %vm2071_vm15  ;;  %v419_v1 = vsel %vm2759_vm8, %v2057_v41, 0  ;;  %vm2162_vm8 = vcmp.ne.s32.totalorder %v478_v62, %v2011_v20 }
  0xa0   : > { %v418_v53 = vsel %vm2754_vm1, %v2054_v38, 0  ;;  %vm2114_vm1 = vcmp.ne.s32.totalorder %v396_v51, %v2009_v19  ;;  %v2834_v5 = vsel %vm2162_vm8, 4294967295, %v2833_v5  ;;  %vm2766_vm5 = vmpackc.low %vm2162_vm8, %vm2157_vm2  ;;  %vm604_vm15 = vcmask 146432   ;;  %v601_v13 = vpop.permute.xlu0 %600 }
  0xa1   : > { %vm2761_vm10 = vmpackc.low %vm2119_vm14, %vm2114_vm1  ;;  %v606_v21 = vunpack.c.l.b16 %v601_v13  ;;  %v607_v22 = vunpack.c.h.b16 %v601_v13  ;;  %vm2268_vm2 = vcmp.ne.s32.totalorder %v687_v36, %v2009_v19  ;;  %v2851_v42 = vmov 0 }
  0xa2   : > { %683 = vrot.lane.b32.xlu0 %v283_v18, %s1899_s14  ;;  %427 = vrot.lane.b32.xlu2 %v418_v53, %s1902_s17  ;;  %v417_v3 = vsel %vm2761_vm10, %v2028_v29, 0  ;;  %v603_v6 = vpop.permute.xlu1 %602  ;;  %vm2172_vm10 = vcmp.ne.s32.totalorder %v485_v0, %v2011_v20  ;;  %v2852_v42 = vsel %vm2268_vm2, 4294967295, %v2851_v42  ;;  %vm2273_vm8 = vcmp.ne.s32.totalorder %v688_v37, %v2011_v20 }
  0xa3   : > { %810 = vrot.lane.b32.xlu1 %v1996_v11, %s1901_s16  ;;  %v2838_v8 = vsel %vm2172_vm10, 4294967295, %v2837_v8  ;;  %v620_v9 = vunpack.c.l.b16 %v603_v6  ;;  %v621_v10 = vunpack.c.h.b16 %v603_v6  ;;  %vm2767_vm13 = vmpackc.low %vm2172_vm10, %vm2167_vm9  ;;  %v498_v11 = vsel %vm2766_vm5, %v2028_v29, 0 }
  0xa4   : > { %v499_v14 = vsel %vm2767_vm13, %v2054_v38, 0  ;;  %v605_v18 = vsel %vm604_vm15, %v601_v13, %v603_v6  ;;  %vm2226_vm15 = vcmp.ne.s32.totalorder %v606_v21, %v2009_v19  ;;  %vm2231_vm9 = vcmp.ne.s32.totalorder %v607_v22, %v2011_v20 }
  0xa5   : > { %vm2201_vm0 = vcmp.ne.s32.totalorder %v620_v9, %v2009_v19  ;;  %vm2206_vm5 = vcmp.ne.s32.totalorder %v621_v10, %v2011_v20  ;;  %v613_v25 = vunpack.c.l.b16 %v605_v18  ;;  %v614_v26 = vunpack.c.h.b16 %v605_v18 }
  0xa6   : > { %v2840_v15 = vsel %vm2201_vm0, 4294967295, %v2839_v15  ;;  %v2842_v16 = vsel %vm2206_vm5, 4294967295, %v2841_v16  ;;  %vm2769_vm13 = vmpackc.low %vm2206_vm5, %vm2201_vm0  ;;  %v2844_v28 = vsel %vm2226_vm15, 4294967295, %v2843_v28  ;;  %v2846_v30 = vsel %vm2231_vm9, 4294967295, %v2845_v30 }
  0xa7   : > { %v629_v27 = vsel %vm2769_vm13, %v2057_v41, 0  ;;  %vm2236_vm13 = vcmp.ne.s32.totalorder %v613_v25, %v2009_v19  ;;  %vm2241_vm10 = vcmp.ne.s32.totalorder %v614_v26, %v2011_v20  ;;  %vm2775_vm0 = vmpackc.low %vm2231_vm9, %vm2226_vm15  ;;  %v2853_v43 = vmov 0 }
  0xa8   : > { %v2848_v32 = vsel %vm2236_vm13, 4294967295, %v2847_v32  ;;  %v2850_v35 = vsel %vm2241_vm10, 4294967295, %v2849_v35  ;;  %vm2776_vm5 = vmpackc.low %vm2241_vm10, %vm2236_vm13  ;;  %v627_v39 = vsel %vm2775_vm0, %v2028_v29, 0  ;;  %v2854_v43 = vsel %vm2273_vm8, 4294967295, %v2853_v43 }
  0xa9   : > { %v628_v40 = vsel %vm2776_vm5, %v2054_v38, 0  ;;  %vm2778_vm0 = vmpackc.low %vm2273_vm8, %vm2268_vm2  ;;  %vm2781_vm5 = vcmask 1039360   ;;  %vm2855_vm13 = vcmask 1043456   ;;  %vm2782_vm10 = vcmask 64512  }
  0xaa   : > { %429 = vrot.lane.b32.xlu0 %v419_v1, %s1902_s17  ;;  %510 = vrot.lane.b32.xlu2 %v500_v2, %s1903_s23  ;;  %v708_v46 = vsel %vm2778_vm0, %v2028_v29, 0  ;;  %vm2856_vm0 = vmmov %vm2855_vm13  ;;  %vm685_vm2 = vcmask 261120   ;;  %v2857_v13 = vmov 0  ;;  %v2859_v18 = vmov 0 }
  0xab   : > { %425 = vrot.lane.b32.xlu1 %v417_v3, %s1902_s17  ;;  %v2861_v21 = vmov 0  ;;  %v2865_v25 = vmov 0  ;;  %vm2867_vm8 = vcmask 64512   ;;  %v2868_v26 = vmov 0 }
  0xac   : > { %vm2870_vm11 = vmmov %vm2867_vm8 }
  0xb2   : > { %506 = vrot.lane.b32.xlu0 %v498_v11, %s1903_s23  ;;  %558 = vrot.lane.b32.xlu2 %v2057_v41, %s1904_s25 }
  0xb3   : > { %508 = vrot.lane.b32.xlu1 %v499_v14, %s1903_s23  ;;  %v300_v14 = vld [vmem:[%s2749_s1] sm:$0xf] }
  0xb4   : > { %1695 = vmatmul.msk.bf16.vlgmr.msra.gmra.mxu2 %vm2867_vm8, %v300_v14  ;;  %1696 = vmatmul.msk.bf16.vlgmr.msra.gmra.mxu3 %vm2870_vm11, %v300_v14 }
  0xba   : > { %554 = vrot.lane.b32.xlu0 %v2028_v29, %s1904_s25  ;;  %639 = vrot.lane.b32.xlu2 %v629_v27, %s1905_s26 }
  0xbb   : > { %556 = vrot.lane.b32.xlu1 %v2054_v38, %s1904_s25 }
  0xc2   : > { %635 = vrot.lane.b32.xlu0 %v627_v39, %s1905_s26 }
  0xc3   : > { %637 = vrot.lane.b32.xlu1 %v628_v40, %s1905_s26 }
  0xca   : > { %716 = vrot.lane.b32.xlu0 %v708_v46, %s1906_s30 }
  0xd2   : > { %764 = vrot.lane.b32.xlu0 %v2028_v29, %s1907_s6 }
  0xec   : > { %v306_v47 = vpop.permute.xlu2 %305 }
  0xf4   : > { %v2290_v49 = vpop.permute.xlu2 %812 }
  0xfc   : > { %v428_v10 = vpop.permute.xlu2 %427 }
 0x10c   : > { %v308_v48 = vpop.permute.xlu0 %307 }
 0x10d   : > { %v310_v50 = vpop.permute.xlu1 %309  ;;  %v312_v51 = vsel %vm2781_vm5, %v306_v47, %v308_v48 }
 0x10e   : > { %v320_v52 = vsel %vm2855_vm13, %v312_v51, 0  ;;  %v313_v53 = vsel %vm2781_vm5, %v308_v48, %v310_v50  ;;  %v830_v50 = vunpack.c.l.b16 %v2290_v49  ;;  %v831_v51 = vunpack.c.h.b16 %v2290_v49 }
 0x10f   : > { %332 = vmatpush.bf16.msra.mxu0 %v320_v52  ;;  %v323_v60 = vsel %vm2856_vm0, %v313_v53, 0  ;;  %v511_v52 = vpop.permute.xlu2 %510 }
 0x110   : > { %345 = vmatpush.bf16.msra.mxu1 %v323_v60 }
 0x112   : > { %1693 = vmatmul.msk.bf16.vlgmr.msra.gmra.mxu0 %vm2782_vm10, %v1692_v61 }
 0x113   : > { %1694 = vmatmul.msk.bf16.vlgmr.msra.gmra.mxu1 %vm2782_vm10, %v1692_v61 }
 0x114   : > { %v684_v62 = vpop.permute.xlu0 %683 }
 0x115   : > { %v811_v63 = vpop.permute.xlu1 %810  ;;  %v686_v0 = vsel %vm685_vm2, %v682_v31, %v684_v62  ;;  %v701_v1 = vunpack.c.l.b16 %v684_v62  ;;  %v702_v2 = vunpack.c.h.b16 %v684_v62  ;;  %v1697_v62 = vld [vmem:[%s2749_s1 + $0x8] sm:$0xf] }
 0x116   : > { %v816_v3 = vunpack.c.l.b16 %v811_v63  ;;  %v817_v6 = vunpack.c.h.b16 %v811_v63  ;;  %v694_v9 = vunpack.c.l.b16 %v686_v0  ;;  %v695_v11 = vunpack.c.h.b16 %v686_v0 }
 0x117   : > { %vm2302_vm0 = vcmp.ne.s32.totalorder %v701_v1, %v2009_v19  ;;  %vm2320_vm5 = vcmp.ne.s32.totalorder %v702_v2, %v2011_v20 }
 0x118   : > { %v2858_v13 = vsel %vm2302_vm0, 4294967295, %v2857_v13  ;;  %vm2310_vm13 = vcmp.ne.s32.totalorder %v816_v3, %v2009_v19  ;;  %vm2315_vm2 = vcmp.ne.s32.totalorder %v817_v6, %v2011_v20  ;;  %vm2325_vm10 = vcmp.ne.s32.totalorder %v694_v9, %v2009_v19  ;;  %vm2789_vm8 = vmpackc.low %vm2320_vm5, %vm2302_vm0 }
 0x119   : > { %v2860_v18 = vsel %vm2310_vm13, 4294967295, %v2859_v18  ;;  %v2862_v21 = vsel %vm2315_vm2, 4294967295, %v2861_v21  ;;  %v2866_v25 = vsel %vm2325_vm10, 4294967295, %v2865_v25  ;;  %vm2788_vm15 = vmpackc.low %vm2315_vm2, %vm2310_vm13  ;;  %vm2335_vm9 = vcmp.ne.s32.totalorder %v695_v11, %v2011_v20 }
 0x11a   : > { %v2869_v26 = vsel %vm2335_vm9, 4294967295, %v2868_v26  ;;  %v837_v27 = vsel %vm2788_vm15, %v2028_v29, 0  ;;  %v710_v31 = vsel %vm2789_vm8, %v2057_v41, 0  ;;  %vm2791_vm11 = vmpackc.low %vm2335_vm9, %vm2325_vm10  ;;  %vm814_vm15 = vcmask 277504  }
 0x11b   : > { %845 = vrot.lane.b32.xlu0 %v837_v27, %s1908_s13  ;;  %720 = vrot.lane.b32.xlu2 %v710_v31, %s1906_s30  ;;  %v709_v29 = vsel %vm2791_vm11, %v2054_v38, 0  ;;  %vm2871_vm8 = vcmask 1043456   ;;  %v815_v47 = vsel %vm814_vm15, %v811_v63, %v2290_v49  ;;  %vm2797_vm11 = vcmask 916480  }
 0x11c   : > { %v430_v36 = vpop.permute.xlu0 %429  ;;  %718 = vrot.lane.b32.xlu1 %v709_v29, %s1906_s30  ;;  %vm2872_vm13 = vmmov %vm2871_vm8  ;;  %v823_v53 = vunpack.c.l.b16 %v815_v47  ;;  %v824_v60 = vunpack.c.h.b16 %v815_v47  ;;  %vm2384_vm15 = vcmp.ne.s32.totalorder %v830_v50, %v2009_v19  ;;  %v2878_v3 = vmov 0 }
 0x11d   : > { %v426_v37 = vpop.permute.xlu1 %425  ;;  %v433_v39 = vsel %vm2792_vm12, %v428_v10, %v430_v36  ;;  %v2880_v6 = vmov 0  ;;  %vm2883_vm2 = vcmask 1043456  }
 0x11e   : > { %v432_v40 = vsel %vm2792_vm12, %v426_v37, %v428_v10  ;;  %v441_v46 = vsel %vm2871_vm8, %v433_v39, 0  ;;  %vm2877_vm8 = vcmask 64512   ;;  %vm2397_vm12 = vcmp.ne.s32.totalorder %v823_v53, %v2009_v19  ;;  %vm2884_vm0 = vmmov %vm2883_vm2  ;;  %v1700_v19 = vld [vmem:[%s2749_s1 + $0xc] sm:$0xf]  ;;  %v1703_v39 = vld [vmem:[%s2749_s1 + $0x10] sm:$0xf] }
 0x11f   : > { %v438_v48 = vsel %vm2872_vm13, %v432_v40, 0  ;;  %463 = vmatpush.bf16.msrb.mxu1 %v441_v46  ;;  %vm2389_vm13 = vcmp.ne.s32.totalorder %v831_v51, %v2011_v20  ;;  %v2879_v3 = vsel %vm2397_vm12, 4294967295, %v2878_v3  ;;  %vm2402_vm10 = vcmp.ne.s32.totalorder %v824_v60, %v2011_v20  ;;  %vm2882_vm9 = vmmov %vm2877_vm8  ;;  %v559_v20 = vpop.permute.xlu2 %558 }
 0x120   : > { %450 = vmatpush.bf16.msrb.mxu0 %v438_v48  ;;  %v2881_v6 = vsel %vm2402_vm10, 4294967295, %v2880_v6 }
 0x123   : > { %768 = vrot.lane.b32.xlu2 %v2057_v41, %s1907_s6  ;;  %1698 = vmatmul.msk.bf16.vlgmr.msrb.gmra.mxu0 %vm2877_vm8, %v1697_v62  ;;  %vm2798_vm8 = vmpackc.low %vm2389_vm13, %vm2384_vm15 }
 0x124   : > { %v507_v61 = vpop.permute.xlu0 %506  ;;  %766 = vrot.lane.b32.xlu1 %v2054_v38, %s1907_s6  ;;  %1699 = vmatmul.msk.bf16.vlgmr.msrb.gmra.mxu1 %vm2882_vm9, %v1697_v62  ;;  %vm2799_vm9 = vmpackc.low %vm2402_vm10, %vm2397_vm12  ;;  %v839_v11 = vsel %vm2798_vm8, %v2057_v41, 0  ;;  %vm641_vm8 = vcmask 900096  }
 0x125   : > { %v509_v63 = vpop.permute.xlu1 %508  ;;  %v838_v14 = vsel %vm2799_vm9, %v2054_v38, 0  ;;  %vm2889_vm9 = vcmask 64512  }
 0x126   : > { %v513_v1 = vsel %vm2797_vm11, %v507_v61, %v509_v63  ;;  %v514_v2 = vsel %vm2797_vm11, %v509_v63, %v511_v52  ;;  %v1706_v52 = vld [vmem:[%s2749_s1 + $0x14] sm:$0xf] }
 0x127   : > { %v519_v9 = vsel %vm2883_vm2, %v513_v1, 0  ;;  %v522_v10 = vsel %vm2884_vm0, %v514_v2, 0  ;;  %vm2800_vm0 = vcmask 908288   ;;  %vm2885_vm2 = vcmask 64512   ;;  %v640_v40 = vpop.permute.xlu2 %639 }
 0x128   : > { %531 = vmatpush.bf16.msrb.mxu2 %v519_v9  ;;  %544 = vmatpush.bf16.msrb.mxu3 %v522_v10  ;;  %vm2886_vm11 = vmmov %vm2885_vm2 }
 0x12b   : > { %1701 = vmatmul.msk.bf16.vlgmr.msrb.gmra.mxu2 %vm2885_vm2, %v1700_v19  ;;  %1702 = vmatmul.msk.bf16.vlgmr.msrb.gmra.mxu3 %vm2886_vm11, %v1700_v19  ;;  %vm2887_vm2 = vcmask 1043456   ;;  %v1709_v19 = vld [vmem:[%s2749_s1 + $0x18] sm:$0xf] }
 0x12c   : > { %849 = vrot.lane.b32.xlu2 %v839_v11, %s1908_s13  ;;  %v555_v27 = vpop.permute.xlu0 %554  ;;  %847 = vrot.lane.b32.xlu1 %v838_v14, %s1908_s13  ;;  %vm2888_vm11 = vmmov %vm2887_vm2 }
 0x12d   : > { %v557_v31 = vpop.permute.xlu1 %556 }
 0x12e   : > { %v562_v41 = vsel %vm2800_vm0, %v557_v31, %v559_v20  ;;  %v561_v29 = vsel %vm2800_vm0, %v555_v27, %v557_v31  ;;  %vm2890_vm0 = vmmov %vm2889_vm9 }
 0x12f   : > { %v570_v36 = vsel %vm2887_vm2, %v562_v41, 0  ;;  %v567_v37 = vsel %vm2888_vm11, %v561_v29, 0  ;;  %vm2891_vm11 = vmmov %vm2887_vm2 }
 0x130   : > { %579 = vmatpush.bf16.msra.mxu0 %v567_v37  ;;  %592 = vmatpush.bf16.msra.mxu1 %v570_v36  ;;  %vm2892_vm12 = vmmov %vm2890_vm0 }
 0x131   : > { %vm2893_vm10 = vmmov %vm2890_vm0 }
 0x133   : > { %1704 = vmatmul.msk.bf16.vlgmr.msra.gmra.mxu0 %vm2889_vm9, %v1703_v39  ;;  %vm2803_vm9 = vcmask 785408  }
 0x134   : > { %v636_v38 = vpop.permute.xlu0 %635  ;;  %1705 = vmatmul.msk.bf16.vlgmr.msra.gmra.mxu1 %vm2890_vm0, %v1703_v39  ;;  %vm2894_vm0 = vmmov %vm2887_vm2  ;;  %v1712_v39 = vld [vmem:[%s2749_s1 + $0x1c] sm:$0xf] }
 0x135   : > { %v638_v46 = vpop.permute.xlu1 %637 }
 0x136   : > { %v643_v47 = vsel %vm641_vm8, %v638_v46, %v640_v40  ;;  %v642_v48 = vsel %vm641_vm8, %v636_v38, %v638_v46 }
 0x137   : > { %v651_v50 = vsel %vm2887_vm2, %v643_v47, 0  ;;  %v648_v51 = vsel %vm2891_vm11, %v642_v48, 0  ;;  %vm2895_vm2 = vmmov %vm2894_vm0  ;;  %vm770_vm11 = vcmask 777216   ;;  %v369_v38 = vpop.f32.mrf.mxu2  ;;  %v382_v46 = vpop.f32.mrf.mxu3 }
 0x138   : > { %660 = vmatpush.bf16.msra.mxu2 %v648_v51  ;;  %673 = vmatpush.bf16.msra.mxu3 %v651_v50 }
 0x13b   : > { %1707 = vmatmul.msk.bf16.vlgmr.msra.gmra.mxu2 %vm2892_vm12, %v1706_v52  ;;  %1708 = vmatmul.msk.bf16.vlgmr.msra.gmra.mxu3 %vm2893_vm10, %v1706_v52  ;;  %vm2896_vm12 = vmmov %vm2893_vm10 }
 0x13c   : > { %v717_v60 = vpop.permute.xlu0 %716 }
 0x144   : > { %v765_v11 = vpop.permute.xlu0 %764 }
 0x175   : > { %v721_v53 = vpop.permute.xlu2 %720 }
 0x17d   : > { %v769_v20 = vpop.permute.xlu2 %768 }
 0x186   : > { %v850_v48 = vpop.permute.xlu2 %849 }
 0x18d   : > { %v846_v50 = vpop.permute.xlu0 %845 }
 0x18e   : > { %v719_v61 = vpop.permute.xlu1 %718 }
 0x18f   : > { %v334_v62 = vpop.f32.mrf.mxu0  ;;  %v723_v63 = vsel %vm2803_vm9, %v717_v60, %v719_v61  ;;  %v724_v1 = vsel %vm2803_vm9, %v719_v61, %v721_v53  ;;  %vm2804_vm9 = vcmask 769024  }
 0x190   : > { %v347_v2 = vpop.f32.mrf.mxu1  ;;  %v729_v9 = vsel %vm2894_vm0, %v723_v63, 0  ;;  %v732_v10 = vsel %vm2895_vm2, %v724_v1, 0  ;;  %vm2897_vm2 = vmmov %vm2894_vm0  ;;  %v370_v40 = vadd.f32 %v369_v38, %v334_v62  ;;  %v1715_v62 = vld [vmem:[%s2749_s1 + $0x20] sm:$0xf]  ;;  %v371_v1 = vpop.f32.mrf.mxu2 }
 0x191   : > { %741 = vmatpush.bf16.msrb.mxu0 %v729_v9  ;;  %754 = vmatpush.bf16.msrb.mxu1 %v732_v10  ;;  %v383_v47 = vadd.f32 %v382_v46, %v347_v2  ;;  %v384_v10 = vpop.f32.mrf.mxu3 }
 0x194   : > { %1710 = vmatmul.msk.bf16.vlgmr.msrb.gmra.mxu0 %vm2893_vm10, %v1709_v19  ;;  %1711 = vmatmul.msk.bf16.vlgmr.msrb.gmra.mxu1 %vm2896_vm12, %v1709_v19  ;;  %vm2898_vm12 = vmmov %vm2893_vm10 }
 0x196   : > { %v767_v14 = vpop.permute.xlu1 %766 }
 0x197   : > { %v336_v27 = vpop.f32.mrf.mxu0  ;;  %v771_v31 = vsel %vm770_vm11, %v765_v11, %v767_v14  ;;  %v772_v41 = vsel %vm770_vm11, %v767_v14, %v769_v20 }
 0x198   : > { %v349_v29 = vpop.f32.mrf.mxu1  ;;  %v777_v36 = vsel %vm2894_vm0, %v771_v31, 0  ;;  %v780_v37 = vsel %vm2897_vm2, %v772_v41, 0  ;;  %vm2899_vm2 = vmmov %vm2894_vm0 }
 0x199   : > { %789 = vmatpush.bf16.msrb.mxu2 %v777_v36  ;;  %802 = vmatpush.bf16.msrb.mxu3 %v780_v37 }
 0x19c   : > { %1713 = vmatmul.msk.bf16.vlgmr.msrb.gmra.mxu2 %vm2893_vm10, %v1712_v39  ;;  %1714 = vmatmul.msk.bf16.vlgmr.msrb.gmra.mxu3 %vm2898_vm12, %v1712_v39  ;;  %vm2900_vm12 = vmmov %vm2893_vm10 }
 0x19e   : > { %v848_v51 = vpop.permute.xlu1 %847 }
 0x19f   : > { %v852_v52 = vsel %vm2804_vm9, %v846_v50, %v848_v51  ;;  %v853_v53 = vsel %vm2804_vm9, %v848_v51, %v850_v48 }
 0x1a0   : > { %v858_v60 = vsel %vm2894_vm0, %v852_v52, 0  ;;  %v861_v61 = vsel %vm2899_vm2, %v853_v53, 0  ;;  %v452_v63 = vpop.f32.mrf.mxu0 }
 0x1a1   : > { %870 = vmatpush.bf16.msra.mxu0 %v858_v60  ;;  %883 = vmatpush.bf16.msra.mxu1 %v861_v61  ;;  %v469_v2 = vadd.f32 %v452_v63, %v370_v40  ;;  %v465_v9 = vpop.f32.mrf.mxu1 }
 0x1a2   : > { %v470_v19 = vadd.f32 %v465_v9, %v383_v47 }
 0x1a4   : > { %1716 = vmatmul.msk.bf16.vlgmr.msra.gmra.mxu0 %vm2893_vm10, %v1715_v62  ;;  %1717 = vmatmul.msk.bf16.vlgmr.msra.gmra.mxu1 %vm2900_vm12, %v1715_v62  ;;  %vm2901_vm12 = vcmask 138240  }
 0x1a5   : > { %vm2905_vm9 = vmmov %vm2901_vm12 }
 0x1a8   : > { %v454_v20 = vpop.f32.mrf.mxu0 }
 0x1a9   : > { %v467_v11 = vpop.f32.mrf.mxu1 }
 0x1ae   : > { %v533_v14 = vpop.f32.mrf.mxu2  ;;  %v546_v27 = vpop.f32.mrf.mxu3 }
 0x1af   : > { %v550_v31 = vadd.f32 %v533_v14, %v469_v2  ;;  %v551_v41 = vadd.f32 %v546_v27, %v470_v19 }
 0x1b0   : > { %v581_v29 = vpop.f32.mrf.mxu0 }
 0x1b1   : > { %v598_v36 = vadd.f32 %v581_v29, %v550_v31  ;;  %v594_v37 = vpop.f32.mrf.mxu1 }
 0x1b2   : > { %v599_v39 = vadd.f32 %v594_v37, %v551_v41 }
 0x1b6   : > { %v535_v38 = vpop.f32.mrf.mxu2  ;;  %v548_v46 = vpop.f32.mrf.mxu3 }
 0x1b8   : > { %v583_v40 = vpop.f32.mrf.mxu0 }
 0x1b9   : > { %v596_v48 = vpop.f32.mrf.mxu1 }
 0x1be   : > { %v662_v50 = vpop.f32.mrf.mxu2  ;;  %v675_v47 = vpop.f32.mrf.mxu3 }
 0x1bf   : > { %v679_v51 = vadd.f32 %v662_v50, %v598_v36  ;;  %v680_v52 = vadd.f32 %v675_v47, %v599_v39 }
 0x1c6   : > { %v664_v53 = vpop.f32.mrf.mxu2  ;;  %v677_v60 = vpop.f32.mrf.mxu3 }
 0x211   : > { %v743_v61 = vpop.f32.mrf.mxu0  ;;  %v756_v62 = vpop.f32.mrf.mxu1 }
 0x212   : > { %v760_v2 = vadd.f32 %v743_v61, %v679_v51  ;;  %v761_v9 = vadd.f32 %v756_v62, %v680_v52 }
 0x219   : > { %v745_v63 = vpop.f32.mrf.mxu0  ;;  %v758_v1 = vpop.f32.mrf.mxu1 }
 0x21f   : > { %v791_v10 = vpop.f32.mrf.mxu2  ;;  %v804_v19 = vpop.f32.mrf.mxu3 }
 0x220   : > { %v808_v20 = vadd.f32 %v791_v10, %v760_v2  ;;  %v809_v11 = vadd.f32 %v804_v19, %v761_v9  ;;  %v891_v10 = vld [vmem:[%s2751_s3] sm:$0xff] }
 0x221   : > { %v872_v14 = vpop.f32.mrf.mxu0  ;;  %v885_v27 = vpop.f32.mrf.mxu1 }
 0x222   : > { %v889_v31 = vadd.f32 %v872_v14, %v808_v20  ;;  %v890_v41 = vadd.f32 %v885_v27, %v809_v11  ;;  %v892_v14 = vld [vmem:[%s2752_s4] sm:$0xff] }
 0x224   : > { %v893_v29 = vadd.f32 %v890_v41, %v889_v31 }
 0x226   : > { %894 = vadd.xlane.f32.xlu0 %v893_v29 }
 0x227   : > { %v793_v36 = vpop.f32.mrf.mxu2  ;;  %v806_v37 = vpop.f32.mrf.mxu3 }
 0x229   : > { %v874_v39 = vpop.f32.mrf.mxu0  ;;  %v887_v38 = vpop.f32.mrf.mxu1 }
 0x299   : > { %v895_v46 = vpop.xlane.xlu0 %894 }
 0x29a   : > { %v896_v40 = vmul.f32 0.00390625, %v895_v46 }
 0x29c   : > { %v897_v48 = vsub.f32 %v889_v31, %v896_v40  ;;  %v898_v50 = vsub.f32 %v890_v41, %v896_v40 }
 0x29e   : > { %v899_v47 = vmul.f32 %v897_v48, %v897_v48  ;;  %v900_v51 = vmul.f32 %v898_v50, %v898_v50 }
 0x2a0   : > { %v901_v52 = vadd.f32 %v900_v51, %v899_v47 }
 0x2a2   : > { %902 = vadd.xlane.f32.xlu1 %v901_v52 }
 0x315   : > { %v903_v53 = vpop.xlane.xlu1 %902 }
 0x316   : > { %v904_v60 = vmul.f32 0.00390625, %v903_v53 }
 0x318   : > { %v905_v61 = vadd.f32 1e-05, %v904_v60 }
 0x31a   : > { %1820 = vrsqrt.f32 %v905_v61  ;;  %vm912_vm2 = vweird.f32 %v905_v61 }
 0x320   : > { %v1821_v62 = vpop.eup %1820 }
 0x321   : > { %v907_v63 = vmul.f32 %v1821_v62, %v905_v61  ;;  %vm913_vm0 = vweird.f32 %v1821_v62 }
 0x322   : > { %vm914_vm10 = vmor %vm912_vm2, %vm913_vm0 }
 0x323   : > { %v908_v1 = vmul.f32 %v1821_v62, %v907_v63  ;;  %vm2902_vm0 = vmpackc.low %vm2119_vm14, %vm2114_vm1  ;;  %vm2908_vm14 = vnez %v2812_v33 }
 0x324   : > { %vm2903_vm2 = vmpackc.low %vm2019_vm7, %vm2014_vm6  ;;  %vm2907_vm7 = vnez %v2814_v34 }
 0x325   : > { %v909_v2 = vmul.f32 0.5, %v908_v1  ;;  %vm2906_vm6 = vmpackc.low %vm2098_vm4, %vm2093_vm3  ;;  %vm2914_vm3 = vnez %v2818_v45  ;;  %vm2915_vm4 = vnez %v2816_v44 }
 0x326   : > { %vm2909_vm1 = vmpackc.low %vm2907_vm7, %vm2908_vm14  ;;  %vm2918_vm7 = vnez %v2824_v56 }
 0x327   : > { %v910_v9 = vsub.f32 1.5, %v909_v2 }
 0x329   : > { %v911_v19 = vmul.f32 %v1821_v62, %v910_v9 }
 0x32b   : > { %v915_v20 = vsel %vm914_vm10, %v1821_v62, %v911_v19  ;;  %vm2904_vm10 = vcmask 1043456   ;;  %v1727_v19 = vld [vmem:[%s2749_s1 + $0x30] sm:$0xf] }
 0x32c   : > { %v916_v11 = vmul.f32 %v915_v20, %v891_v10 }
 0x32e   : > { %919 = vperm.xlu2 %1817, %v916_v11  }
 0x336   : > { %926 = vperm.xlu2 %1817, %v892_v14  }
 0x388   : > { %v920_v27 = vpop.permute.xlu2 %919 }
 0x389   : > { %v922_v31 = vmul.f32 %v920_v27, %v897_v48  ;;  %v923_v41 = vmul.f32 %v920_v27, %v898_v50 }
 0x390   : > { %v927_v29 = vpop.permute.xlu2 %926 }
 0x391   : > { %v929_v36 = vadd.f32 %v927_v29, %v922_v31  ;;  %v930_v37 = vadd.f32 %v927_v29, %v923_v41 }
 0x393   : > { %v931_v39 = vmax.f32 %v929_v36, 0.0  ;;  %v932_v38 = vmax.f32 %v930_v37, 0.0 }
 0x395   : > { %v933_v46 = vpack.c.bf16 %v932_v38, %v931_v39 }
 0x397   : > { %v935_v40 = vunpack.c.l.b16 %v933_v46  ;;  %v936_v51 = vunpack.c.h.b16 %v933_v46 }
 0x399   : > { %v937_v47 = vpack.c.b16 %v935_v40, %v935_v40  ;;  %v938_v52 = vpack.c.b16 %v936_v51, %v936_v51  ;;  %v1730_v51 = vld [vmem:[%s2749_s1 + $0x34] sm:$0xf] }
 0x39b   : > { %939 = vrot.lane.b32.xlu2 %v937_v47, %s1896_s11 }
 0x3a3   : > { %941 = vrot.lane.b32.xlu2 %v938_v52, %s1896_s11  ;;  %v1733_v52 = vld [vmem:[%s2749_s1 + $0x38] sm:$0xf] }
 0x3f5   : > { %v940_v53 = vpop.permute.xlu2 %939 }
 0x3f6   : > { %v946_v60 = vsel %vm2901_vm12, 0, %v940_v53 }
 0x3f7   : > { %959 = vrot.lane.b32.xlu2 %v946_v60, %s1900_s15  ;;  %v1037_v48 = vsel %vm2902_vm0, %v946_v60, 0  ;;  %v951_v50 = vsel %vm2903_vm2, %v946_v60, 0  ;;  %vm2910_vm0 = vmmov %vm2904_vm10  ;;  %vm2912_vm2 = vnez %v2832_v4 }
 0x3f8   : > { %1045 = vrot.lane.b32.xlu1 %v1037_v48, %s1902_s17  ;;  %v1006_v61 = vsel %vm2904_vm10, %v951_v50, 0 }
 0x3f9   : > { %1018 = vmatpush.bf16.msrb.mxu0 %v1006_v61 }
 0x3fd   : > { %v942_v62 = vpop.permute.xlu2 %941 }
 0x3fe   : > { %v943_v63 = vsel %vm2901_vm12, %v940_v53, %v942_v62  ;;  %v949_v59 = vsel %vm2905_vm9, %v942_v62, 0  ;;  %vm2911_vm9 = vnez %v2834_v5  ;;  %vm2916_vm12 = vmpackc.low %vm2914_vm3, %vm2915_vm4  ;;  %vm2926_vm4 = vnez %v2838_v8 }
 0x3ff   : > { %963 = vrot.lane.b32.xlu0 %v949_v59, %s1900_s15  ;;  %961 = vrot.lane.b32.xlu2 %v943_v63, %s1900_s15  ;;  %v1092_v23 = vsel %vm2906_vm6, %v949_v59, 0  ;;  %v952_v24 = vsel %vm2909_vm1, %v943_v63, 0  ;;  %vm2913_vm10 = vmpackc.low %vm2911_vm9, %vm2912_vm2  ;;  %v1038_v34 = vsel %vm2916_vm12, %v943_v63, 0  ;;  %vm2917_vm6 = vnez %v2826_v57 }
 0x400   : > { %1102 = vrot.lane.b32.xlu1 %v1092_v23, %s1903_s23  ;;  %v1009_v58 = vsel %vm2910_vm0, %v952_v24, 0  ;;  %v1090_v55 = vsel %vm2913_vm10, %v946_v60, 0  ;;  %vm2919_vm14 = vmpackc.low %vm2917_vm6, %vm2918_vm7  ;;  %vm2920_vm1 = vnez %v2842_v16  ;;  %vm2921_vm0 = vnez %v2840_v15  ;;  %v1718_v16 = vld [vmem:[%s2749_s1 + $0x24] sm:$0xf] }
 0x401   : > { %1031 = vmatpush.bf16.msrb.mxu1 %v1009_v58  ;;  %v1039_v33 = vsel %vm2919_vm14, %v949_v59, 0  ;;  %vm2922_vm9 = vmpackc.low %vm2920_vm1, %vm2921_vm0  ;;  %vm2923_vm2 = vnez %v2846_v30  ;;  %vm2924_vm10 = vnez %v2844_v28  ;;  %vm2927_vm12 = vnez %v2836_v7 }
 0x402   : > { %v1192_v44 = vsel %vm2922_vm9, %v949_v59, 0  ;;  %vm2925_vm3 = vmpackc.low %vm2923_vm2, %vm2924_vm10  ;;  %vm2929_vm7 = vnez %v2858_v13  ;;  %vm2931_vm1 = vnez %v2854_v43  ;;  %vm2932_vm0 = vnez %v2852_v42  ;;  %v1719_v42 = vld [vmem:[%s2749_s1 + $0x28] sm:$0xf] }
 0x403   : > { %v1190_v45 = vsel %vm2925_vm3, %v946_v60, 0  ;;  %vm2928_vm6 = vmpackc.low %vm2926_vm4, %vm2927_vm12  ;;  %vm2934_vm2 = vnez %v2850_v35  ;;  %vm2935_vm10 = vnez %v2848_v32  ;;  %vm2938_vm4 = vnez %v2862_v21 }
 0x404   : > { %v1091_v54 = vsel %vm2928_vm6, %v943_v63, 0  ;;  %vm2930_vm14 = vmpackc.low %vm2320_vm5, %vm2929_vm7  ;;  %vm2939_vm12 = vnez %v2860_v18  ;;  %vm2941_vm7 = vnez %v2869_v26 }
 0x405   : > { %v1245_v56 = vsel %vm2930_vm14, %v949_v59, 0  ;;  %vm2933_vm9 = vmpackc.low %vm2931_vm1, %vm2932_vm0  ;;  %vm2942_vm14 = vnez %v2866_v25  ;;  %v1724_v25 = vld [vmem:[%s2749_s1 + $0x2c] sm:$0xf] }
 0x406   : > { %v1243_v57 = vsel %vm2933_vm9, %v946_v60, 0  ;;  %vm2936_vm5 = vmpackc.low %vm2934_vm2, %vm2935_vm10  ;;  %vm2947_vm9 = vcmask 64512   ;;  %vm2949_vm10 = vcmask 1039360  }
 0x407   : > { %1098 = vrot.lane.b32.xlu0 %v1090_v55, %s1903_s23  ;;  %1047 = vrot.lane.b32.xlu2 %v1038_v34, %s1902_s17  ;;  %v1191_v4 = vsel %vm2936_vm5, %v943_v63, 0  ;;  %vm2937_vm3 = vmpackc.low %vm2389_vm13, %vm2384_vm15  ;;  %vm2944_vm15 = vnez %v2881_v6  ;;  %vm2945_vm13 = vnez %v2879_v3  ;;  %vm2950_vm5 = vcmask 1043456  }
 0x408   : > { %1149 = vrot.lane.b32.xlu1 %v949_v59, %s1904_s25  ;;  %v1345_v5 = vsel %vm2937_vm3, %v949_v59, 0  ;;  %vm2940_vm6 = vmpackc.low %vm2938_vm4, %vm2939_vm12  ;;  %1722 = vmatmul.msk.bf16.vlgmr.msrb.gmra.mxu0 %vm2947_vm9, %v1718_v16  ;;  %vm2952_vm4 = vcmask 1031168  }
 0x409   : > { %v1343_v7 = vsel %vm2940_vm6, %v946_v60, 0  ;;  %vm2943_vm1 = vmpackc.low %vm2941_vm7, %vm2942_vm14 }
 0x40a   : > { %v1244_v8 = vsel %vm2943_vm1, %v943_v63, 0  ;;  %vm2946_vm0 = vmpackc.low %vm2944_vm15, %vm2945_vm13  ;;  %vm2958_vm15 = vcmask 916480  }
 0x40b   : > { %v1344_v15 = vsel %vm2946_vm0, %v943_v63, 0  ;;  %vm2948_vm2 = vmmov %vm2947_vm9 }
 0x40c   : > { %1723 = vmatmul.msk.bf16.vlgmr.msrb.gmra.mxu1 %vm2948_vm2, %v1718_v16  ;;  %vm2951_vm3 = vmmov %vm2948_vm2 }
 0x40d   : > { %vm2953_vm12 = vmmov %vm2950_vm5 }
 0x40e   : > { %vm2954_vm6 = vmmov %vm2948_vm2 }
 0x40f   : > { %1145 = vrot.lane.b32.xlu0 %v946_v60, %s1904_s25  ;;  %1049 = vrot.lane.b32.xlu2 %v1039_v33, %s1902_s17  ;;  %vm2955_vm7 = vmmov %vm2952_vm4  ;;  %s1850_s17 = scalar_lea.hbm %s2753_s5, 32 }
 0x410   : > { %1202 = vrot.lane.b32.xlu1 %v1192_v44, %s1905_s26  ;;  %vm2956_vm14 = vmmov %vm2949_vm10 }
 0x411   : > { %vm2957_vm1 = vmmov %vm2950_vm5 }
 0x412   : > { %vm2959_vm13 = vmmov %vm2957_vm1 }
 0x413   : > { %vm2960_vm0 = vmmov %vm2957_vm1 }
 0x414   : > { %vm2961_vm9 = vmmov %vm2948_vm2 }
 0x417   : > { %1198 = vrot.lane.b32.xlu0 %v1190_v45, %s1905_s26  ;;  %1100 = vrot.lane.b32.xlu2 %v1091_v54, %s1903_s23  ;;  %v1736_v45 = vld [vmem:[%s2749_s1 + $0x3c] sm:$0xf]  ;;  %v1739_v54 = vld [vmem:[%s2749_s1 + $0x40] sm:$0xf] }
 0x418   : > { %1255 = vrot.lane.b32.xlu1 %v1245_v56, %s1906_s30 }
 0x41f   : > { %1251 = vrot.lane.b32.xlu0 %v1243_v57, %s1906_s30  ;;  %1147 = vrot.lane.b32.xlu2 %v943_v63, %s1904_s25  ;;  %s215_s25 = sand.u32 1, %s1884_s19  }
 0x420   : > { %1302 = vrot.lane.b32.xlu1 %v949_v59, %s1907_s6 }
 0x427   : > { %1298 = vrot.lane.b32.xlu0 %v946_v60, %s1907_s6  ;;  %1200 = vrot.lane.b32.xlu2 %v1191_v4, %s1905_s26  ;;  %s1689_s26 = sshll.u32 %s215_s25, 4 }
 0x428   : > { %1355 = vrot.lane.b32.xlu1 %v1345_v5, %s1908_s13  ;;  %s217_s16 = scalar_lea.vmem [#allocation2], %s1689_s26 }
 0x429   : > { %s1623_s7 = sshll.u32 %s217_s16, 4  ;;  %s1624_s7 = int_to_ptr.vmem [resolvable:$true] %s1623_s7 }
 0x42f   : > { %1351 = vrot.lane.b32.xlu0 %v1343_v7, %s1908_s13  ;;  %1253 = vrot.lane.b32.xlu2 %v1244_v8, %s1906_s30  ;;  %s1762_s30 = sshll.u32 %s1960_s22, 4  ;;  %s1610_s22 = scalar_lea.sflag [#allocation3], %s215_s25 }
 0x430   : > { %s1621_s14 = scalar_lea.hbm %s2753_s5, %s1762_s30 }
 0x431   : > { %s1625_s8 = sshll.u32 %s1621_s14, 4  ;;  %s1626_s8 = int_to_ptr.hbm [resolvable:$true] %s1625_s8 }
 0x432   : > { %s1844_s10 = sshra.s32 %s1626_s8, 4  ;;  %s1845_s10 = int_to_ptr.hbm [resolvable:$true] %s1844_s10 }
 0x433   : > { %s1846_s12 = scalar_lea.hbm %s1845_s10, 16  ;;  %p1851_p0 = scmp.lt.s32.totalorder %s1845_s10, %s2753_s5 }
 0x434   : > { %p1847_p11 = scmp.ne.s32.totalorder %s1845_s10, %s1846_s12  ;;  %p1852_p1 = scmp.lt.s32.totalorder %s1850_s17, %s1846_s12 }
 0x436   : > { %p1848_p12 = pnand %p1847_p11, %p1977_p5  ;;  %p1853_p2 = por %p1852_p1, %p1851_p0 }
 0x437   : > { %1300 = vrot.lane.b32.xlu2 %v943_v63, %s1907_s6 }
 0x438   : > { %p1849_p13 = pneg %p1848_p12 }
 0x43a   : > { %p1854_p3 = pnand %p1853_p2, %p1849_p13 }
 0x43f   : > { %1353 = vrot.lane.b32.xlu2 %v1344_v15, %s1908_s13 }
 0x451   : > { %v960_v28 = vpop.permute.xlu2 %959 }
 0x459   : > { %v962_v30 = vpop.permute.xlu2 %961 }
 0x45a   : > { %v965_v32 = vsel %vm2949_vm10, %v960_v28, %v962_v30  ;;  %vm2962_vm10 = vmmov %vm2958_vm15 }
 0x45b   : > { %v971_v35 = vsel %vm2950_vm5, %v965_v32, 0  ;;  %vm2963_vm5 = vmmov %vm2960_vm0  ;;  %v1440_v32 = vld [vmem:[%s2750_s2] sm:$0xf] }
 0x45c   : > { %983 = vmatpush.bf16.msra.mxu2 %v971_v35 }
 0x45f   : > { %1720 = vmatmul.msk.bf16.vlgmr.msra.gmra.mxu2 %vm2951_vm3, %v1719_v42  ;;  %vm2964_vm3 = vcmask 908288  }
 0x461   : > { %v1048_v43 = vpop.permute.xlu2 %1047 }
 0x469   : > { %v1050_v13 = vpop.permute.xlu2 %1049 }
 0x46a   : > { %v1046_v18 = vpop.permute.xlu1 %1045  ;;  %v1052_v26 = vsel %vm2955_vm7, %v1048_v43, %v1050_v13  ;;  %vm2968_vm7 = vmmov %vm2960_vm0 }
 0x46b   : > { %v1051_v21 = vsel %vm2952_vm4, %v1046_v18, %v1048_v43  ;;  %v1060_v9 = vsel %vm2959_vm13, %v1052_v26, 0  ;;  %vm2965_vm4 = vmmov %vm2960_vm0 }
 0x46c   : > { %v1057_v22 = vsel %vm2953_vm12, %v1051_v21, 0  ;;  %vm2966_vm12 = vmmov %vm2948_vm2 }
 0x46d   : > { %1069 = vmatpush.bf16.msrb.mxu2 %v1057_v22 }
 0x470   : > { %1725 = vmatmul.msk.bf16.vlgmr.msrb.gmra.mxu2 %vm2954_vm6, %v1724_v25  ;;  %vm2967_vm6 = vmmov %vm2964_vm3 }
 0x471   : > { %v964_v0 = vpop.permute.xlu0 %963  ;;  %v1101_v49 = vpop.permute.xlu2 %1100 }
 0x472   : > { %v966_v3 = vsel %vm2956_vm14, %v962_v30, %v964_v0  ;;  %v1103_v6 = vpop.permute.xlu1 %1102  ;;  %vm2969_vm14 = vmmov %vm2960_vm0 }
 0x473   : > { %v974_v1 = vsel %vm2957_vm1, %v966_v3, 0  ;;  %v1105_v2 = vsel %vm2958_vm15, %v1101_v49, %v1103_v6  ;;  %vm2970_vm1 = vmmov %vm2948_vm2 }
 0x474   : > { %v1113_v10 = vsel %vm2960_vm0, %v1105_v2, 0  ;;  %996 = vmatpush.bf16.msra.mxu3 %v974_v1  ;;  %vm2971_vm15 = vmmov %vm2970_vm1 }
 0x475   : > { %1135 = vmatpush.bf16.msra.mxu1 %v1113_v10  ;;  %vm2972_vm13 = vmmov %vm2970_vm1 }
 0x477   : > { %1721 = vmatmul.msk.bf16.vlgmr.msra.gmra.mxu3 %vm2961_vm9, %v1719_v42  ;;  %vm2973_vm9 = vcmask 785408  }
 0x478   : > { %1082 = vmatpush.bf16.msrb.mxu3 %v1060_v9  ;;  %1729 = vmatmul.msk.bf16.vlgmr.msra.gmra.mxu1 %vm2948_vm2, %v1727_v19  ;;  %vm2974_vm2 = vmmov %vm2960_vm0 }
 0x479   : > { %v1099_v20 = vpop.permute.xlu0 %1098  ;;  %v1148_v11 = vpop.permute.xlu2 %1147 }
 0x47a   : > { %v1104_v14 = vsel %vm2962_vm10, %v1099_v20, %v1101_v49  ;;  %v1150_v27 = vpop.permute.xlu1 %1149  ;;  %vm2975_vm10 = vmmov %vm2970_vm1 }
 0x47b   : > { %v1110_v31 = vsel %vm2963_vm5, %v1104_v14, 0  ;;  %v1152_v41 = vsel %vm2964_vm3, %v1148_v11, %v1150_v27  ;;  %vm2976_vm5 = vmmov %vm2973_vm9 }
 0x47c   : > { %v1160_v29 = vsel %vm2965_vm4, %v1152_v41, 0  ;;  %1122 = vmatpush.bf16.msra.mxu0 %v1110_v31  ;;  %vm2977_vm3 = vmmov %vm2960_vm0 }
 0x47d   : > { %1182 = vmatpush.bf16.msra.mxu3 %v1160_v29  ;;  %vm2979_vm4 = vmmov %vm2960_vm0 }
 0x47f   : > { %1728 = vmatmul.msk.bf16.vlgmr.msra.gmra.mxu0 %vm2966_vm12, %v1727_v19  ;;  %vm2980_vm12 = vmmov %vm2970_vm1 }
 0x481   : > { %v1146_v36 = vpop.permute.xlu0 %1145  ;;  %v1201_v37 = vpop.permute.xlu2 %1200 }
 0x482   : > { %v1151_v39 = vsel %vm2967_vm6, %v1146_v36, %v1148_v11  ;;  %v1203_v38 = vpop.permute.xlu1 %1202  ;;  %vm2981_vm6 = vmmov %vm2970_vm1 }
 0x483   : > { %v1157_v46 = vsel %vm2968_vm7, %v1151_v39, 0  ;;  %v1205_v40 = vsel %vm641_vm8, %v1201_v37, %v1203_v38  ;;  %vm2982_vm7 = vmmov %vm2970_vm1 }
 0x484   : > { %v1213_v47 = vsel %vm2969_vm14, %v1205_v40, 0  ;;  %1169 = vmatpush.bf16.msra.mxu2 %v1157_v46  ;;  %vm2983_vm14 = vmmov %vm2960_vm0 }
 0x485   : > { %1235 = vmatpush.bf16.msrb.mxu1 %v1213_v47  ;;  %v1445_v5 = vsel %vm2983_vm14, %v1998_v12, 0  ;;  %v1742_v12 = vld [vmem:[%s2749_s1 + $0x44] sm:$0xf]  ;;  %v1020_v35 = vpop.f32.mrf.mxu0 }
 0x487   : > { %1726 = vmatmul.msk.bf16.vlgmr.msrb.gmra.mxu3 %vm2970_vm1, %v1724_v25  ;;  %1731 = vmatmul.msk.bf16.vlgmr.msra.gmra.mxu2 %vm2971_vm15, %v1730_v51  ;;  %vm2984_vm1 = vmmov %vm2960_vm0  ;;  %vm2985_vm15 = vcmask 769024  }
 0x488   : > { %1735 = vmatmul.msk.bf16.vlgmr.msrb.gmra.mxu1 %vm2972_vm13, %v1733_v52  ;;  %vm2986_vm13 = vmmov %vm2960_vm0 }
 0x489   : > { %v1199_v53 = vpop.permute.xlu0 %1198  ;;  %v1254_v60 = vpop.permute.xlu2 %1253 }
 0x48a   : > { %v1204_v48 = vsel %vm641_vm8, %v1199_v53, %v1201_v37  ;;  %v1256_v50 = vpop.permute.xlu1 %1255  ;;  %vm2978_vm8 = vmmov %vm2960_vm0  ;;  %v1033_v42 = vpop.f32.mrf.mxu1 }
 0x48b   : > { %v1210_v61 = vsel %vm2960_vm0, %v1204_v48, 0  ;;  %v1258_v62 = vsel %vm2973_vm9, %v1254_v60, %v1256_v50  ;;  %v1448_v33 = vsel %vm2978_vm8, %v2003_v17, 0  ;;  %vm2987_vm0 = vmmov %vm2981_vm6 }
 0x48c   : > { %v1266_v63 = vsel %vm2974_vm2, %v1258_v62, 0  ;;  %1222 = vmatpush.bf16.msrb.mxu0 %v1210_v61  ;;  %vm2988_vm9 = vmmov %vm2985_vm15 }
 0x48d   : > { %1288 = vmatpush.bf16.msrb.mxu3 %v1266_v63  ;;  %vm2989_vm2 = vmmov %vm2984_vm1  ;;  %v1022_v43 = vpop.f32.mrf.mxu0 }
 0x48e   : > { %vm2994_vm8 = vmmov %vm2987_vm0 }
 0x48f   : > { %1734 = vmatmul.msk.bf16.vlgmr.msrb.gmra.mxu0 %vm2975_vm10, %v1733_v52  ;;  %vm2991_vm10 = vmmov %vm2987_vm0 }
 0x491   : > { %v1252_v59 = vpop.permute.xlu0 %1251  ;;  %v1301_v23 = vpop.permute.xlu2 %1300 }
 0x492   : > { %v1257_v24 = vsel %vm2976_vm5, %v1252_v59, %v1254_v60  ;;  %v1303_v58 = vpop.permute.xlu1 %1302  ;;  %vm2992_vm5 = vmmov %vm2987_vm0  ;;  %v1035_v13 = vpop.f32.mrf.mxu1 }
 0x493   : > { %v1263_v55 = vsel %vm2977_vm3, %v1257_v24, 0  ;;  %v1305_v34 = vsel %vm770_vm11, %v1301_v23, %v1303_v58  ;;  %vm2993_vm3 = vmmov %vm2987_vm0 }
 0x494   : > { %v1313_v44 = vsel %vm2979_vm4, %v1305_v34, 0  ;;  %1275 = vmatpush.bf16.msrb.mxu2 %v1263_v55 }
 0x495   : > { %1335 = vmatpush.bf16.msra.mxu1 %v1313_v44 }
 0x497   : > { %1732 = vmatmul.msk.bf16.vlgmr.msra.gmra.mxu3 %vm2980_vm12, %v1730_v51  ;;  %1737 = vmatmul.msk.bf16.vlgmr.msrb.gmra.mxu2 %vm2981_vm6, %v1736_v45 }
 0x498   : > { %1741 = vmatmul.msk.bf16.vlgmr.msra.gmra.mxu1 %vm2982_vm7, %v1739_v54 }
 0x499   : > { %1470 = vmatpush.bf16.msrb.mxu1 %v1448_v33  ;;  %v1299_v17 = vpop.permute.xlu0 %1298  ;;  %v1354_v56 = vpop.permute.xlu2 %1353 }
 0x49a   : > { %v1304_v57 = vsel %vm770_vm11, %v1299_v17, %v1301_v23  ;;  %v1356_v4 = vpop.permute.xlu1 %1355  ;;  %vm2990_vm11 = vmmov %vm2987_vm0 }
 0x49b   : > { %v1310_v7 = vsel %vm2984_vm1, %v1304_v57, 0  ;;  %v1358_v8 = vsel %vm2985_vm15, %v1354_v56, %v1356_v4  ;;  %vm2995_vm15 = vmmov %vm2989_vm2 }
 0x49c   : > { %v1366_v15 = vsel %vm2986_vm13, %v1358_v8, 0  ;;  %1322 = vmatpush.bf16.msra.mxu0 %v1310_v7  ;;  %vm2996_vm13 = vmmov %vm2989_vm2 }
 0x49d   : > { %1388 = vmatpush.bf16.msra.mxu3 %v1366_v15 }
 0x49f   : > { %1740 = vmatmul.msk.bf16.vlgmr.msra.gmra.mxu0 %vm2987_vm0, %v1739_v54 }
 0x4a0   : > { %1457 = vmatpush.bf16.msrb.mxu0 %v1445_v5 }
 0x4a1   : > { %v1352_v16 = vpop.permute.xlu0 %1351 }
 0x4a2   : > { %v1357_v28 = vsel %vm2988_vm9, %v1352_v16, %v1354_v56  ;;  %vm2997_vm9 = vmmov %vm2987_vm0 }
 0x4a3   : > { %v1363_v30 = vsel %vm2989_vm2, %v1357_v28, 0 }
 0x4a4   : > { %1375 = vmatpush.bf16.msra.mxu2 %v1363_v30 }
 0x4a7   : > { %1738 = vmatmul.msk.bf16.vlgmr.msrb.gmra.mxu3 %vm2990_vm11, %v1736_v45  ;;  %1743 = vmatmul.msk.bf16.vlgmr.msra.gmra.mxu2 %vm2991_vm10, %v1742_v12 }
 0x4a8   : > { %1748 = vmatmul.msk.bf16.vlgmr.msrb.gmra.mxu1 %vm2992_vm5, %v1440_v32 }
 0x4af   : > { %1747 = vmatmul.msk.bf16.vlgmr.msrb.gmra.mxu0 %vm2993_vm3, %v1440_v32 }
 0x4b7   : > { %1744 = vmatmul.msk.bf16.vlgmr.msra.gmra.mxu3 %vm2994_vm8, %v1742_v12 }
 0x4e2   : > { %v985_v18 = vpop.f32.mrf.mxu2 }
 0x4e3   : > { %v1021_v21 = vadd.f32 %v1020_v35, %v985_v18 }
 0x4ea   : > { %v987_v22 = vpop.f32.mrf.mxu2 }
 0x4f3   : > { %v1071_v25 = vpop.f32.mrf.mxu2 }
 0x4f4   : > { %v1088_v48 = vadd.f32 %v1071_v25, %v1021_v21 }
 0x4f5   : > { %v1137_v26 = vpop.f32.mrf.mxu1 }
 0x4fa   : > { %v998_v0 = vpop.f32.mrf.mxu3 }
 0x4fb   : > { %v1073_v49 = vpop.f32.mrf.mxu2  ;;  %v1034_v51 = vadd.f32 %v1033_v42, %v998_v0 }
 0x4fc   : > { %v1124_v3 = vpop.f32.mrf.mxu0 }
 0x4fd   : > { %v1139_v6 = vpop.f32.mrf.mxu1  ;;  %v1141_v61 = vadd.f32 %v1124_v3, %v1088_v48 }
 0x502   : > { %v1000_v1 = vpop.f32.mrf.mxu3 }
 0x504   : > { %v1126_v2 = vpop.f32.mrf.mxu0 }
 0x505   : > { %v1237_v9 = vpop.f32.mrf.mxu1 }
 0x50a   : > { %v1084_v10 = vpop.f32.mrf.mxu3  ;;  %v1171_v19 = vpop.f32.mrf.mxu2 }
 0x50b   : > { %v1089_v52 = vadd.f32 %v1084_v10, %v1034_v51  ;;  %v1188_v23 = vadd.f32 %v1171_v19, %v1141_v61 }
 0x50c   : > { %v1224_v20 = vpop.f32.mrf.mxu0 }
 0x50d   : > { %v1239_v11 = vpop.f32.mrf.mxu1  ;;  %v1142_v62 = vadd.f32 %v1137_v26, %v1089_v52  ;;  %v1241_v34 = vadd.f32 %v1224_v20, %v1188_v23  ;;  %v1746_v26 = vld [vmem:[%s2752_s4 + $0x8] sm:$0xff]  ;;  %v1750_v52 = vld [vmem:[%s2752_s4 + $0x10] sm:$0xff] }
 0x512   : > { %v1086_v14 = vpop.f32.mrf.mxu3  ;;  %v1173_v27 = vpop.f32.mrf.mxu2 }
 0x513   : > { %v1749_v14 = vld [vmem:[%s2751_s3 + $0x10] sm:$0xff] }
 0x514   : > { %v1226_v31 = vpop.f32.mrf.mxu0 }
 0x515   : > { %v1337_v41 = vpop.f32.mrf.mxu1 }
 0x51a   : > { %v1184_v29 = vpop.f32.mrf.mxu3  ;;  %v1277_v36 = vpop.f32.mrf.mxu2 }
 0x51b   : > { %v1189_v24 = vadd.f32 %v1184_v29, %v1142_v62  ;;  %v1294_v45 = vadd.f32 %v1277_v36, %v1241_v34 }
 0x51c   : > { %v1324_v37 = vpop.f32.mrf.mxu0 }
 0x51d   : > { %v1339_v39 = vpop.f32.mrf.mxu1  ;;  %v1242_v33 = vadd.f32 %v1237_v9, %v1189_v24  ;;  %v1341_v17 = vadd.f32 %v1324_v37, %v1294_v45 }
 0x522   : > { %v1186_v38 = vpop.f32.mrf.mxu3  ;;  %v1279_v46 = vpop.f32.mrf.mxu2 }
 0x523   : > { %v1745_v46 = vld [vmem:[%s2751_s3 + $0x8] sm:$0xff] }
 0x524   : > { %v1326_v40 = vpop.f32.mrf.mxu0 }
 0x525   : > { %v1472_v47 = vpop.f32.mrf.mxu1 }
 0x52a   : > { %v1290_v53 = vpop.f32.mrf.mxu3  ;;  %v1377_v60 = vpop.f32.mrf.mxu2 }
 0x52b   : > { %v1295_v54 = vadd.f32 %v1290_v53, %v1242_v33  ;;  %v1394_v4 = vadd.f32 %v1377_v60, %v1341_v17 }
 0x52c   : > { %v1459_v50 = vpop.f32.mrf.mxu0 }
 0x52d   : > { %v1474_v63 = vpop.f32.mrf.mxu1  ;;  %v1480_v59 = vadd.f32 %v1472_v47, %v1459_v50  ;;  %v1342_v56 = vadd.f32 %v1337_v41, %v1295_v54 }
 0x52f   : > { %1481 = vadd.xlane.f32.xlu2 %v1480_v59 }
 0x532   : > { %v1292_v58 = vpop.f32.mrf.mxu3  ;;  %v1379_v55 = vpop.f32.mrf.mxu2 }
 0x534   : > { %v1461_v44 = vpop.f32.mrf.mxu0 }
 0x53a   : > { %v1390_v57 = vpop.f32.mrf.mxu3 }
 0x53b   : > { %v1395_v5 = vadd.f32 %v1390_v57, %v1342_v56 }
 0x53d   : > { %v1400_v7 = vadd.f32 %v1395_v5, %v1394_v4 }
 0x53f   : > { %1401 = vadd.xlane.f32.xlu0 %v1400_v7  ;;  %v1751_v7 = vld [vmem:[%s2750_s2 + $0x4] sm:$0xf] }
 0x542   : > { %v1392_v8 = vpop.f32.mrf.mxu3 }
 0x5a2   : > { %v1482_v15 = vpop.xlane.xlu2 %1481 }
 0x5a3   : > { %v1483_v16 = vmul.f32 0.00390625, %v1482_v15 }
 0x5a5   : > { %v1484_v28 = vsub.f32 %v1459_v50, %v1483_v16  ;;  %v1485_v30 = vsub.f32 %v1472_v47, %v1483_v16 }
 0x5a7   : > { %v1486_v12 = vmul.f32 %v1484_v28, %v1484_v28  ;;  %v1487_v32 = vmul.f32 %v1485_v30, %v1485_v30 }
 0x5a9   : > { %v1488_v35 = vadd.f32 %v1487_v32, %v1486_v12 }
 0x5ab   : > { %1489 = vadd.xlane.f32.xlu0 %v1488_v35 }
 0x5b2   : > { %v1402_v42 = vpop.xlane.xlu0 %1401 }
 0x5b3   : > { %v1403_v43 = vmul.f32 0.00390625, %v1402_v42 }
 0x5b5   : > { %v1404_v13 = vsub.f32 %v1394_v4, %v1403_v43  ;;  %v1405_v18 = vsub.f32 %v1395_v5, %v1403_v43 }
 0x5b7   : > { %v1406_v21 = vmul.f32 %v1404_v13, %v1404_v13  ;;  %v1407_v22 = vmul.f32 %v1405_v18, %v1405_v18 }
 0x5b9   : > { %v1408_v25 = vadd.f32 %v1407_v22, %v1406_v21 }
 0x5bb   : > { %1409 = vadd.xlane.f32.xlu1 %v1408_v25 }
 0x5bf   : > { %1433 = vperm.xlu0 %1819, %v1746_v26  }
 0x61e   : > { %v1490_v0 = vpop.xlane.xlu0 %1489 }
 0x61f   : > { %v1491_v49 = vmul.f32 0.00390625, %v1490_v0 }
 0x621   : > { %v1492_v3 = vadd.f32 1e-05, %v1491_v49 }
 0x623   : > { %1822 = vrsqrt.f32 %v1492_v3  ;;  %vm1499_vm12 = vweird.f32 %v1492_v3 }
 0x629   : > { %v1823_v6 = vpop.eup %1822 }
 0x62a   : > { %v1494_v1 = vmul.f32 %v1823_v6, %v1492_v3  ;;  %vm1500_vm4 = vweird.f32 %v1823_v6 }
 0x62b   : > { %vm1501_vm6 = vmor %vm1499_vm12, %vm1500_vm4 }
 0x62c   : > { %v1495_v2 = vmul.f32 %v1823_v6, %v1494_v1  ;;  %v1754_v1 = vld [vmem:[%s2751_s3 + $0x18] sm:$0xff] }
 0x62e   : > { %v1496_v9 = vmul.f32 0.5, %v1495_v2  ;;  %v1410_v10 = vpop.xlane.xlu1 %1409 }
 0x62f   : > { %v1411_v19 = vmul.f32 0.00390625, %v1410_v10 }
 0x630   : > { %v1497_v20 = vsub.f32 1.5, %v1496_v9 }
 0x631   : > { %v1412_v11 = vadd.f32 1e-05, %v1411_v19  ;;  %v1434_v50 = vpop.permute.xlu0 %1433  ;;  %v1755_v19 = vld [vmem:[%s2752_s4 + $0x18] sm:$0xff] }
 0x632   : > { %v1498_v27 = vmul.f32 %v1823_v6, %v1497_v20 }
 0x633   : > { %1824 = vrsqrt.f32 %v1412_v11  ;;  %vm1419_vm14 = vweird.f32 %v1412_v11 }
 0x634   : > { %v1502_v31 = vsel %vm1501_vm6, %v1823_v6, %v1498_v27 }
 0x635   : > { %v1503_v41 = vmul.f32 %v1749_v14, %v1502_v31 }
 0x637   : > { %1506 = vperm.xlu1 %1818, %v1503_v41  }
 0x639   : > { %v1825_v29 = vpop.eup %1824 }
 0x63a   : > { %v1414_v36 = vmul.f32 %v1825_v29, %v1412_v11  ;;  %vm1420_vm7 = vweird.f32 %v1825_v29 }
 0x63b   : > { %vm1421_vm1 = vmor %vm1419_vm14, %vm1420_vm7 }
 0x63c   : > { %v1415_v37 = vmul.f32 %v1825_v29, %v1414_v36 }
 0x63e   : > { %v1416_v39 = vmul.f32 0.5, %v1415_v37  ;;  %v1828_v37 = vld [vmem:[%s1992_s9] sm:$0xff] }
 0x640   : > { %v1417_v38 = vsub.f32 1.5, %v1416_v39 }
 0x642   : > { %v1418_v40 = vmul.f32 %v1825_v29, %v1417_v38  ;;  %v1829_v38 = vld [vmem:[%s1992_s9 + $0x8] sm:$0xff] }
 0x644   : > { %v1422_v47 = vsel %vm1421_vm1, %v1825_v29, %v1418_v40 }
 0x645   : > { %v1423_v51 = vmul.f32 %v1745_v46, %v1422_v47 }
 0x647   : > { %1426 = vperm.xlu2 %1817, %v1423_v51  }
 0x64f   : > { %1513 = vperm.xlu2 %1817, %v1750_v52  }
 0x6a1   : > { %v1427_v53 = vpop.permute.xlu2 %1426 }
 0x6a2   : > { %v1429_v60 = vmul.f32 %v1427_v53, %v1404_v13  ;;  %v1430_v48 = vmul.f32 %v1427_v53, %v1405_v18 }
 0x6a4   : > { %v1436_v62 = vadd.f32 %v1434_v50, %v1429_v60  ;;  %v1437_v63 = vadd.f32 %v1434_v50, %v1430_v48 }
 0x6a6   : > { %v1438_v34 = vmax.f32 %v1436_v62, 0.0  ;;  %v1439_v33 = vmax.f32 %v1437_v63, 0.0 }
 0x6a9   : > { %v1507_v61 = vpop.permute.xlu1 %1506  ;;  %v1514_v24 = vpop.permute.xlu2 %1513 }
 0x6aa   : > { %v1509_v59 = vmul.f32 %v1507_v61, %v1484_v28  ;;  %v1510_v23 = vmul.f32 %v1507_v61, %v1485_v30 }
 0x6ac   : > { %v1516_v58 = vadd.f32 %v1514_v24, %v1509_v59  ;;  %v1517_v55 = vadd.f32 %v1514_v24, %v1510_v23 }
 0x6ae   : > { %v1518_v44 = vmax.f32 %v1516_v58, 0.0  ;;  %v1519_v45 = vmax.f32 %v1517_v55, 0.0 }
 0x6b0   : > { %v1520_v54 = vadd.f32 %v1518_v44, %v1438_v34  ;;  %v1521_v17 = vadd.f32 %v1519_v45, %v1439_v33 }
 0x6b2   : > { %v1524_v56 = vpack.c.bf16 %v1520_v54, %v1520_v54  ;;  %v1525_v57 = vpack.c.bf16 %v1521_v17, %v1521_v17 }
 0x6b4   : > { %v1530_v4 = vsel %vm2995_vm15, %v1524_v56, 0  ;;  %v1533_v5 = vsel %vm2996_vm13, %v1525_v57, 0 }
 0x6b5   : > { %1542 = vmatpush.bf16.msrb.mxu2 %v1530_v4  ;;  %1555 = vmatpush.bf16.msrb.mxu3 %v1533_v5 }
 0x6b8   : > { %1752 = vmatmul.msk.bf16.vlgmr.msrb.gmra.mxu2 %vm2987_vm0, %v1751_v7  ;;  %1753 = vmatmul.msk.bf16.vlgmr.msrb.gmra.mxu3 %vm2997_vm9, %v1751_v7 }
 0x73b   : > { %v1544_v8 = vpop.f32.mrf.mxu2  ;;  %v1557_v15 = vpop.f32.mrf.mxu3 }
 0x73c   : > { %v1565_v16 = vadd.f32 %v1557_v15, %v1544_v8 }
 0x73e   : > { %1566 = vadd.xlane.f32.xlu1 %v1565_v16 }
 0x743   : > { %v1546_v28 = vpop.f32.mrf.mxu2  ;;  %v1559_v30 = vpop.f32.mrf.mxu3 }
 0x7b1   : > { %v1567_v12 = vpop.xlane.xlu1 %1566 }
 0x7b2   : > { %v1568_v32 = vmul.f32 0.00390625, %v1567_v12 }
 0x7b4   : > { %v1569_v35 = vsub.f32 %v1544_v8, %v1568_v32  ;;  %v1570_v42 = vsub.f32 %v1557_v15, %v1568_v32 }
 0x7b6   : > { %v1571_v43 = vmul.f32 %v1569_v35, %v1569_v35  ;;  %v1572_v13 = vmul.f32 %v1570_v42, %v1570_v42 }
 0x7b8   : > { %v1573_v18 = vadd.f32 %v1572_v13, %v1571_v43 }
 0x7ba   : > { %1574 = vadd.xlane.f32.xlu2 %v1573_v18 }
 0x82d   : > { %v1575_v21 = vpop.xlane.xlu2 %1574 }
 0x82e   : > { %v1576_v22 = vmul.f32 0.00390625, %v1575_v21 }
 0x830   : > { %v1577_v25 = vadd.f32 1e-05, %v1576_v22 }
 0x832   : > { %1826 = vrsqrt.f32 %v1577_v25  ;;  %vm1584_vm11 = vweird.f32 %v1577_v25 }
 0x838   : > { %v1827_v26 = vpop.eup %1826 }
 0x839   : > { %v1579_v0 = vmul.f32 %v1827_v26, %v1577_v25  ;;  %vm1585_vm2 = vweird.f32 %v1827_v26 }
 0x83a   : > { %vm1586_vm10 = vmor %vm1584_vm11, %vm1585_vm2 }
 0x83b   : > { %v1580_v49 = vmul.f32 %v1827_v26, %v1579_v0 }
 0x83d   : > { %v1581_v3 = vmul.f32 0.5, %v1580_v49 }
 0x83f   : > { %v1582_v6 = vsub.f32 1.5, %v1581_v3 }
 0x841   : > { %v1583_v2 = vmul.f32 %v1827_v26, %v1582_v6 }
 0x843   : > { %v1587_v9 = vsel %vm1586_vm10, %v1827_v26, %v1583_v2 }
 0x844   : > { %v1588_v10 = vmul.f32 %v1754_v1, %v1587_v9 }
 0x846   : > { %1591 = vperm.xlu0 %1819, %v1588_v10  }
 0x84e   : > { %1598 = vperm.xlu0 %1819, %v1755_v19  }
 0x8b8   : > { %v1592_v20 = vpop.permute.xlu0 %1591 }
 0x8b9   : > { %v1594_v11 = vmul.f32 %v1592_v20, %v1569_v35  ;;  %v1595_v14 = vmul.f32 %v1592_v20, %v1570_v42 }
 0x8c0   : > { %v1599_v27 = vpop.permute.xlu0 %1598 }
 0x8c1   : > { %v1601_v31 = vadd.f32 %v1599_v27, %v1594_v11  ;;  %v1602_v41 = vadd.f32 %v1599_v27, %v1595_v14 }
 0x8c3   : > { %v1603_v29 = vmax.f32 %v1601_v31, 0.0  ;;  %v1604_v36 = vmax.f32 %v1602_v41, 0.0 }
 0x8c5   : > { %v1605_v39 = vadd.f32 %v1828_v37, %v1603_v29  ;;  %v1606_v46 = vadd.f32 %v1829_v38, %v1604_v36 }
 0x8c7   : > { %1607 = vst [vmem:[%s217_s16] sm:$0xff] %v1605_v39 }
 0x8c8   : > { %1608 = vst [vmem:[%s217_s16 + $0x8] sm:$0xff] %v1606_v46 }
 0x8c9   : > { %1857 = shalt.err (!%p1854_p3)
}
 0x8ca   : > { %1763 = dma.vmem_to_hbm [thread:$0]  (%p1977_p5), %s1624_s7, 256, %s1626_s8, %s1610_s22  }
 0x8cb PF: > { %p1769_p4 = scmp.ge.s32.totalorder %s1892_s21, 2  ;;  %s1637_s9 = sand.u32 1, %s1880_s18  }
 0x8cc   : > { %s1638_s25 = scalar_lea.sflag [#allocation3], %s1637_s9 }
 0x8cd   : > { %p1766_p7 = pnand %p1769_p4, %p1981_p6 }
 0x8cf   : > { %p1767_p8 = pneg %p1766_p7 }
 0x8d1   : > { %1875 = dma.done.wait (%p1767_p8), %s1638_s25, 256  }
 0x8d2   : > { %1877 = vsyncadd (%p1767_p8), %s1638_s25, 4294967040  ;;  %p15_p9 = scmp.ge.s32.totalorder %s1964_s24, 4   ;;  %s2998_s18 = smov %s1884_s19 }
 0x8d3   : > { %s2999_s19 = smov %s1888_s20  ;;  %s3000_s20 = smov %s1975_s27 }
 0x8d4   : > { %s3001_s21 = smov %s1964_s24  ;;  %17 = sbr.rel (!%p15_p9) target bundleno = 3 (0x3), region = 99 }
 0x8d9   :  { %1644 = vsyncpa [#allocation3], 1 }
 0x8da   :  { %1646 = vsyncpa [#allocation3 + $0x1], 1 }

</bundles_post_ra>
